<compile_context>
chip_gen: v7x
topology: tpu7x:2x2x1
jax: 0.10.0
libtpu: 0.0.40
codegen_flags: <defaults>
</compile_context>

<pallas_src>
import functools
import math

import jax
import jax.numpy as jnp
from jax.experimental import pallas as pl
from jax.experimental.pallas import tpu as pltpu

NEG_FILL = -1e6                                   # torch's mask / scatter fill value
_BIG_NEG = float(jnp.finfo(jnp.float32).min)      # internal "remove from max" value


def _dot_nt(a, b):
    """a:(M,K) x b:(N,K) -> (M,N) = a @ b^T, f32 accumulate on the MXU."""
    return jax.lax.dot_general(
        a, b, dimension_numbers=(((1,), (1,)), ((), ())),
        preferred_element_type=jnp.float32)


def _kth_largest(scores, k):
    """k-th largest value of each row (last axis) via k rounds of max-only masking.
    Exact for distinct scores; ties at the -1e6 fill are harmless (see module doc)."""
    remaining = scores
    kth = None
    for _ in range(k):                            # k is a small static int
        kth = jnp.max(remaining, axis=-1, keepdims=True)
        remaining = jnp.where(remaining >= kth, _BIG_NEG, remaining)
    return kth


def _topk_softmax(scores, k):
    """Keep the top-k entries of each row, fill the rest with -1e6, softmax over
    the row. Mirrors torch topk+scatter+softmax. f32 in/out."""
    kth = _kth_largest(scores, k)
    masked = jnp.where(scores >= kth, scores, jnp.float32(NEG_FILL))
    masked = masked - jnp.max(masked, axis=-1, keepdims=True)
    e = jnp.exp(masked)
    return e * pl.reciprocal(jnp.sum(e, axis=-1, keepdims=True), approx=True)


def _token_combine(tok_scores, stat_w, S, T, kt):
    """tok_scores (Q, S*T); for each contiguous T-column segment s: keep the top-kt
    entries, fill the rest with -1e6, softmax within the segment, scale by
    stat_w[:, s].  Returns the fused combine-weight matrix (Q, S*T) so the whole
    token-level context is ONE (Q,S*T)x(S*T,H) matmul (no per-slot matmuls)."""
    f32 = jnp.float32
    lane = jax.lax.broadcasted_iota(jnp.int32, tok_scores.shape, 1)
    combine = jnp.zeros(tok_scores.shape, f32)
    for s in range(S):                            # static unroll: VPU/XLU only
        in_seg = (lane >= s * T) & (lane < (s + 1) * T)
        sc = jnp.where(in_seg, tok_scores, _BIG_NEG)
        kth = _kth_largest(sc, kt)
        masked = jnp.where(sc >= kth, sc, f32(NEG_FILL))
        m = jnp.max(masked, axis=-1, keepdims=True)           # segment max (real score)
        e = jnp.where(in_seg, jnp.exp(masked - m), f32(0.0))
        w = e * pl.reciprocal(jnp.sum(e, axis=-1, keepdims=True), approx=True)
        stat_col = jax.lax.slice_in_dim(stat_w, s, s + 1, axis=1)   # (Q, 1) static slice
        combine = combine + w * stat_col
    return combine


def _selective_attention_kernel(vl_ref,           # (B,) int32, scalar-prefetched (SMEM)
                                q_ref, sk_ref, tk_ref, val_ref,
                                wqs_ref, wqt_ref, wks_ref, wkt_ref, wv_ref, wo_ref,
                                o_ref, ctx_ref,
                                *, Bb, Q, S, T, ks, kt):
    f32 = jnp.float32
    g = pl.program_id(0)
    ST = S * T

    # ---- six projections on the full (Bb*rows, D) slabs: fills the MXU M dim.
    # Operands are fed in their input dtype (bf16 stays bf16), f32 accumulate.
    q_stat = jnp.dot(q_ref[...], wqs_ref[...], preferred_element_type=f32)    # (Bb*Q, H)
    q_tok = jnp.dot(q_ref[...], wqt_ref[...], preferred_element_type=f32)     # (Bb*Q, H)
    k_stat = jnp.dot(sk_ref[...], wks_ref[...], preferred_element_type=f32)   # (Bb*S, H)
    k_tok = jnp.dot(tk_ref[...], wkt_ref[...], preferred_element_type=f32)    # (Bb*ST, H)
    v = jnp.dot(val_ref[...], wv_ref[...], preferred_element_type=f32)        # (Bb*ST, H)

    H = q_stat.shape[-1]
    scale = f32(1.0 / math.sqrt(H))

    # ---- per-batch-item attention (small static loop; every op is 2-D) ------------
    for b in range(Bb):
        q_stat_b = jax.lax.slice_in_dim(q_stat, b * Q, (b + 1) * Q, axis=0)    # (Q, H)
        q_tok_b = jax.lax.slice_in_dim(q_tok, b * Q, (b + 1) * Q, axis=0)      # (Q, H)
        k_stat_b = jax.lax.slice_in_dim(k_stat, b * S, (b + 1) * S, axis=0)    # (S, H)
        k_tok_b = jax.lax.slice_in_dim(k_tok, b * ST, (b + 1) * ST, axis=0)    # (ST, H)
        v_b = jax.lax.slice_in_dim(v, b * ST, (b + 1) * ST, axis=0)            # (ST, H)

        # static level: valid-length mask, top-ks, softmax
        stat_scores = _dot_nt(q_stat_b, k_stat_b) * scale                      # (Q, S)
        col = jax.lax.broadcasted_iota(jnp.int32, stat_scores.shape, 1)
        stat_scores = jnp.where(col < vl_ref[g * Bb + b], stat_scores, f32(NEG_FILL))
        stat_w = _topk_softmax(stat_scores, ks)                                # (Q, S)

        # token level: ONE score matmul + fused combine weights + ONE context matmul
        tok_scores = _dot_nt(q_tok_b, k_tok_b) * scale                         # (Q, ST)
        combine = _token_combine(tok_scores, stat_w, S, T, kt)                 # (Q, ST)
        ctx_ref[pl.ds(b * Q, Q), :] = jnp.dot(combine, v_b,
                                              preferred_element_type=f32)      # (Q, H)

    # ---- output projection on the whole (Bb*Q, H) slab ---------------------------
    out = jnp.dot(ctx_ref[...], wo_ref[...], preferred_element_type=f32)
    o_ref[...] = out.astype(o_ref.dtype)


def _pick_block_b(B, Q, S, T, Dq, Dk, Dv, H, itemsize):
    """Batch items per grid step: target Bb*Q ~ 256 MXU rows, bounded by a
    conservative VMEM budget (v7x has 64 MiB/TC) and by a divisor of B whose row
    counts keep all block sublane dims 8-aligned (or full)."""
    per_item_in = 2 * (Q * Dq + S * Dk + S * T * (Dk + Dv) + Q * H) * itemsize
    per_item_f32 = 4 * (4 * Q * H + S * H + 2 * S * T * H + 4 * Q * S * T)
    budget = 24 * 1024 * 1024
    cap = max(1, budget // max(per_item_in + per_item_f32, 1))
    target = max(1, (256 + Q - 1) // Q)
    bb = int(min(B, cap, target, 16))

    def rows_ok(n):
        return all(r % 8 == 0 or r == t
                   for r, t in ((n * Q, B * Q), (n * S, B * S), (n * S * T, B * S * T)))

    while bb > 1 and (B % bb or not rows_ok(bb)):
        bb -= 1
    if B % bb or not rows_ok(bb):
        bb = B                                    # full batch in one step: always legal
    return bb


def selective_attention(queries, stat_keys, token_keys, values, stat_valid_lens,
                        w_q_stat, w_q_token, w_k_stat, w_k_token, w_v, w_o,
                        stat_k, token_k, *, block_b=None, vmem_limit_bytes=None):
    """queries (B,Q,Dq); stat_keys (B,S,Dk); token_keys (B*S,T,Dk);
    values (B*S,T,Dv); stat_valid_lens (B,) int. Weights are (in, out) layout
    (transpose of torch nn.Linear.weight). Returns (B, Q, H)."""
    B, Q, Dq = queries.shape
    Bs, S, Dk = stat_keys.shape
    assert Bs == B
    BS, T, _ = token_keys.shape
    assert BS == B * S
    Dv = values.shape[-1]
    H = w_q_stat.shape[-1]

    ks = min(S - 1, int(stat_k))                  # same clamp as the torch module
    kt = min(T - 1, int(token_k))
    assert ks >= 1 and kt >= 1

    Bb = int(block_b) if block_b is not None else _pick_block_b(
        B, Q, S, T, Dq, Dk, Dv, H, queries.dtype.itemsize)
    assert B % Bb == 0
    G = B // Bb

    # Host-side: flatten every row axis so the kernel sees lane-dense 2-D slabs and
    # needs no in-kernel reshapes; projections then run on Bb*{Q,S,S*T}-row tiles.
    q2 = queries.reshape(B * Q, Dq)
    sk2 = stat_keys.reshape(B * S, Dk)
    tk2 = token_keys.reshape(B * S * T, Dk)
    v2 = values.reshape(B * S * T, Dv)
    vl = stat_valid_lens.astype(jnp.int32)

    kernel = functools.partial(_selective_attention_kernel,
                               Bb=Bb, Q=Q, S=S, T=T, ks=ks, kt=kt)

    itemsize = queries.dtype.itemsize
    if vmem_limit_bytes is None:
        blk = 2 * Bb * (Q * Dq + S * Dk + S * T * (Dk + Dv) + Q * H) * itemsize
        wts = 2 * (2 * Dq * H + 2 * Dk * H + Dv * H + H * H) * w_q_stat.dtype.itemsize
        interm = 4 * Bb * (4 * Q * H + S * H + 2 * S * T * H + 4 * Q * S * T)
        # cap at 64 MiB so the same default is safe on v7x; v6e/v5e callers with huge
        # shapes can pass a larger value explicitly.
        vmem_limit_bytes = min(64 * 1024 * 1024,
                               max(32 * 1024 * 1024, 2 * (blk + wts + interm)))

    flops = 2 * B * (2 * Q * Dq * H + S * Dk * H + S * T * Dk * H + S * T * Dv * H
                     + Q * S * H + 2 * Q * S * T * H + Q * H * H)
    bytes_accessed = ((queries.size + stat_keys.size + token_keys.size + values.size
                       + B * Q * H) * itemsize
                      + (w_q_stat.size + w_q_token.size + w_k_stat.size
                         + w_k_token.size + w_v.size + w_o.size)
                      * w_q_stat.dtype.itemsize)

    out2 = pl.pallas_call(
        kernel,
        out_shape=jax.ShapeDtypeStruct((B * Q, H), queries.dtype),
        grid_spec=pltpu.PrefetchScalarGridSpec(
            num_scalar_prefetch=1,                # stat_valid_lens -> SMEM
            grid=(G,),
            in_specs=[
                pl.BlockSpec((Bb * Q, Dq), lambda g, vl: (g, 0)),
                pl.BlockSpec((Bb * S, Dk), lambda g, vl: (g, 0)),
                pl.BlockSpec((Bb * S * T, Dk), lambda g, vl: (g, 0)),
                pl.BlockSpec((Bb * S * T, Dv), lambda g, vl: (g, 0)),
                pl.BlockSpec((Dq, H), lambda g, vl: (0, 0)),
                pl.BlockSpec((Dq, H), lambda g, vl: (0, 0)),
                pl.BlockSpec((Dk, H), lambda g, vl: (0, 0)),
                pl.BlockSpec((Dk, H), lambda g, vl: (0, 0)),
                pl.BlockSpec((Dv, H), lambda g, vl: (0, 0)),
                pl.BlockSpec((H, H), lambda g, vl: (0, 0)),
            ],
            out_specs=pl.BlockSpec((Bb * Q, H), lambda g, vl: (g, 0)),
            scratch_shapes=[pltpu.VMEM((Bb * Q, H), jnp.float32)],
        ),
        compiler_params=pltpu.CompilerParams(
            dimension_semantics=("parallel",),
            vmem_limit_bytes=int(vmem_limit_bytes),
        ),
        cost_estimate=pl.CostEstimate(
            flops=int(flops),
            transcendentals=int(B * Q * S * (1 + T)),
            bytes_accessed=int(bytes_accessed),
        ),
    )(vl, q2, sk2, tk2, v2, w_q_stat, w_q_token, w_k_stat, w_k_token, w_v, w_o)
    return out2.reshape(B, Q, H)


def selective_attention_ref(queries, stat_keys, token_keys, values, stat_valid_lens,
                            w_q_stat, w_q_token, w_k_stat, w_k_token, w_v, w_o,
                            stat_k, token_k):
    """Pure-JAX mirror of the PyTorch forward (uses lax.top_k)."""
    P = jax.lax.Precision.HIGHEST
    q_stat = jnp.einsum('bqd,dh->bqh', queries, w_q_stat, precision=P)
    q_tok = jnp.einsum('bqd,dh->bqh', queries, w_q_token, precision=P)
    k_stat = jnp.einsum('bsd,dh->bsh', stat_keys, w_k_stat, precision=P)
    k_tok = jnp.einsum('ntd,dh->nth', token_keys, w_k_token, precision=P)
    v = jnp.einsum('ntd,dh->nth', values, w_v, precision=P)
    B, Q, H = q_stat.shape
    S = k_stat.shape[1]
    T = k_tok.shape[1]
    scale = 1.0 / math.sqrt(H)

    stat_scores = jnp.einsum('bqh,bsh->bqs', q_stat, k_stat, precision=P) * scale
    valid_mask = jnp.arange(S)[None, None, :] < stat_valid_lens[:, None, None]
    stat_scores = jnp.where(valid_mask, stat_scores, NEG_FILL)
    ks = min(S - 1, int(stat_k))
    _, idx = jax.lax.top_k(stat_scores, ks)
    keep = jnp.any(idx[..., None] == jnp.arange(S)[None, None, None, :], axis=-2)
    stat_w = jax.nn.softmax(jnp.where(keep, stat_scores, NEG_FILL), axis=-1)

    q_tok_rep = jnp.repeat(q_tok, S, axis=0)                                  # (B*S,Q,H)
    tok_scores = jnp.einsum('nqh,nth->nqt', q_tok_rep, k_tok, precision=P) * scale
    kt = min(T - 1, int(token_k))
    _, tidx = jax.lax.top_k(tok_scores, kt)
    tkeep = jnp.any(tidx[..., None] == jnp.arange(T)[None, None, None, :], axis=-2)
    tok_w = jax.nn.softmax(jnp.where(tkeep, tok_scores, NEG_FILL), axis=-1)   # (B*S,Q,T)
    tok_w = tok_w.reshape(B, S, Q, T).transpose(0, 2, 1, 3)                   # (B,Q,S,T)

    combine = (stat_w[..., None] * tok_w).reshape(B, Q, S * T)
    v_flat = v.reshape(B, S * T, H)
    ctx = jnp.einsum('bqn,bnh->bqh', combine, v_flat, precision=P)
    return jnp.einsum('bqh,ho->bqo', ctx, w_o, precision=P)


if __name__ == "__main__":
    # Small shapes: batch=2, query_num=8, stat_num=4, token_num=8,
    # query/key/value size=16, num_hiddens=32, stat_k=2, token_k=3.
    B, Q, S, T = 2, 8, 4, 8
    Dq = Dk = Dv = 16
    H = 32
    stat_k, token_k = 2, 3

    key = jax.random.PRNGKey(0)
    keys = jax.random.split(key, 10)
    queries = jax.random.normal(keys[0], (B, Q, Dq), dtype=jnp.float32)
    stat_keys = jax.random.normal(keys[1], (B, S, Dk), dtype=jnp.float32)
    token_keys = jax.random.normal(keys[2], (B * S, T, Dk), dtype=jnp.float32)
    values = jax.random.normal(keys[3], (B * S, T, Dv), dtype=jnp.float32)
    stat_valid_lens = jnp.array([3, 4], dtype=jnp.int32)

    def linear_init(k, fan_in, fan_out):
        bound = 1.0 / math.sqrt(fan_in)
        return jax.random.uniform(k, (fan_in, fan_out), jnp.float32, -bound, bound)

    w_q_stat = linear_init(keys[4], Dq, H)
    w_q_token = linear_init(keys[5], Dq, H)
    w_k_stat = linear_init(keys[6], Dk, H)
    w_k_token = linear_init(keys[7], Dk, H)
    w_v = linear_init(keys[8], Dv, H)
    w_o = linear_init(keys[9], H, H)

    out = selective_attention(queries, stat_keys, token_keys, values, stat_valid_lens,
                              w_q_stat, w_q_token, w_k_stat, w_k_token, w_v, w_o,
                              stat_k, token_k)
    out = jax.block_until_ready(out)

    ref = selective_attention_ref(queries, stat_keys, token_keys, values, stat_valid_lens,
                                  w_q_stat, w_q_token, w_k_stat, w_k_token, w_v, w_o,
                                  stat_k, token_k)

    assert out.shape == (B, Q, H)
    max_diff = jnp.max(jnp.abs(out - ref))
    assert jnp.allclose(out, ref, atol=3e-3, rtol=3e-3), \
        f"mismatch vs reference, max diff={max_diff}"

    print("KERNEL_OK")
</pallas_src>

<mosaic_0001>
module attributes {stable_mosaic.version = 11 : i64} {
  func.func @_selective_attention_kernel(%arg0: i32, %arg1: memref<2xi32, #tpu.memory_space<smem>>, %arg2: memref<16x16xf32, #tpu.memory_space<vmem>>, %arg3: memref<8x16xf32, #tpu.memory_space<vmem>>, %arg4: memref<64x16xf32, #tpu.memory_space<vmem>>, %arg5: memref<64x16xf32, #tpu.memory_space<vmem>>, %arg6: memref<16x32xf32, #tpu.memory_space<vmem>>, %arg7: memref<16x32xf32, #tpu.memory_space<vmem>>, %arg8: memref<16x32xf32, #tpu.memory_space<vmem>>, %arg9: memref<16x32xf32, #tpu.memory_space<vmem>>, %arg10: memref<16x32xf32, #tpu.memory_space<vmem>>, %arg11: memref<32x32xf32, #tpu.memory_space<vmem>>, %arg12: memref<16x32xf32, #tpu.memory_space<vmem>>, %arg13: memref<16x32xf32, #tpu.memory_space<vmem>>) attributes {dimension_semantics = [#tpu.dimension_semantics<parallel>], iteration_bounds = array<i64: 1>, scalar_prefetch = 1 : i64, scratch_operands = 1 : i64, tpu.core_type = #tpu.core_type<tc>, window_params = [{transform_indices = @transform_0, window_bounds = array<i64: 16, 16>}, {transform_indices = @transform_1, window_bounds = array<i64: 8, 16>}, {transform_indices = @transform_2, window_bounds = array<i64: 64, 16>}, {transform_indices = @transform_3, window_bounds = array<i64: 64, 16>}, {pipeline_mode = #tpu.pipeline_mode<synchronous>, transform_indices = @transform_4, window_bounds = array<i64: 16, 32>}, {pipeline_mode = #tpu.pipeline_mode<synchronous>, transform_indices = @transform_5, window_bounds = array<i64: 16, 32>}, {pipeline_mode = #tpu.pipeline_mode<synchronous>, transform_indices = @transform_6, window_bounds = array<i64: 16, 32>}, {pipeline_mode = #tpu.pipeline_mode<synchronous>, transform_indices = @transform_7, window_bounds = array<i64: 16, 32>}, {pipeline_mode = #tpu.pipeline_mode<synchronous>, transform_indices = @transform_8, window_bounds = array<i64: 16, 32>}, {pipeline_mode = #tpu.pipeline_mode<synchronous>, transform_indices = @transform_9, window_bounds = array<i64: 32, 32>}, {transform_indices = @transform_10, window_bounds = array<i64: 16, 32>}]} {
    %c0 = arith.constant 0 : index
    %c0_0 = arith.constant 0 : index
    %0 = vector.load %arg2[%c0, %c0_0] : memref<16x16xf32, #tpu.memory_space<vmem>>, vector<16x16xf32>
    %c0_1 = arith.constant 0 : index
    %c0_2 = arith.constant 0 : index
    %1 = vector.load %arg6[%c0_1, %c0_2] : memref<16x32xf32, #tpu.memory_space<vmem>>, vector<16x32xf32>
    %cst = arith.constant dense<0.000000e+00> : vector<16x32xf32>
    %2 = tpu.matmul %0, %1, %cst {dimension_numbers = #tpu.dot_dimension_numbers<[1], [0], [0], [1], [0, 0, 1, 1], [], []>} : vector<16x16xf32>, vector<16x32xf32>, vector<16x32xf32> -> vector<16x32xf32>
    %c0_3 = arith.constant 0 : index
    %c0_4 = arith.constant 0 : index
    %3 = vector.load %arg2[%c0_3, %c0_4] : memref<16x16xf32, #tpu.memory_space<vmem>>, vector<16x16xf32>
    %c0_5 = arith.constant 0 : index
    %c0_6 = arith.constant 0 : index
    %4 = vector.load %arg7[%c0_5, %c0_6] : memref<16x32xf32, #tpu.memory_space<vmem>>, vector<16x32xf32>
    %cst_7 = arith.constant dense<0.000000e+00> : vector<16x32xf32>
    %5 = tpu.matmul %3, %4, %cst_7 {dimension_numbers = #tpu.dot_dimension_numbers<[1], [0], [0], [1], [0, 0, 1, 1], [], []>} : vector<16x16xf32>, vector<16x32xf32>, vector<16x32xf32> -> vector<16x32xf32>
    %c0_8 = arith.constant 0 : index
    %c0_9 = arith.constant 0 : index
    %6 = vector.load %arg3[%c0_8, %c0_9] : memref<8x16xf32, #tpu.memory_space<vmem>>, vector<8x16xf32>
    %c0_10 = arith.constant 0 : index
    %c0_11 = arith.constant 0 : index
    %7 = vector.load %arg8[%c0_10, %c0_11] : memref<16x32xf32, #tpu.memory_space<vmem>>, vector<16x32xf32>
    %cst_12 = arith.constant dense<0.000000e+00> : vector<8x32xf32>
    %8 = tpu.matmul %6, %7, %cst_12 {dimension_numbers = #tpu.dot_dimension_numbers<[1], [0], [0], [1], [0, 0, 1, 1], [], []>} : vector<8x16xf32>, vector<16x32xf32>, vector<8x32xf32> -> vector<8x32xf32>
    %c0_13 = arith.constant 0 : index
    %c0_14 = arith.constant 0 : index
    %9 = vector.load %arg4[%c0_13, %c0_14] : memref<64x16xf32, #tpu.memory_space<vmem>>, vector<64x16xf32>
    %c0_15 = arith.constant 0 : index
    %c0_16 = arith.constant 0 : index
    %10 = vector.load %arg9[%c0_15, %c0_16] : memref<16x32xf32, #tpu.memory_space<vmem>>, vector<16x32xf32>
    %cst_17 = arith.constant dense<0.000000e+00> : vector<64x32xf32>
    %11 = tpu.matmul %9, %10, %cst_17 {dimension_numbers = #tpu.dot_dimension_numbers<[1], [0], [0], [1], [0, 0, 1, 1], [], []>} : vector<64x16xf32>, vector<16x32xf32>, vector<64x32xf32> -> vector<64x32xf32>
    %c0_18 = arith.constant 0 : index
    %c0_19 = arith.constant 0 : index
    %12 = vector.load %arg5[%c0_18, %c0_19] : memref<64x16xf32, #tpu.memory_space<vmem>>, vector<64x16xf32>
    %c0_20 = arith.constant 0 : index
    %c0_21 = arith.constant 0 : index
    %13 = vector.load %arg10[%c0_20, %c0_21] : memref<16x32xf32, #tpu.memory_space<vmem>>, vector<16x32xf32>
    %cst_22 = arith.constant dense<0.000000e+00> : vector<64x32xf32>
    %14 = tpu.matmul %12, %13, %cst_22 {dimension_numbers = #tpu.dot_dimension_numbers<[1], [0], [0], [1], [0, 0, 1, 1], [], []>} : vector<64x16xf32>, vector<16x32xf32>, vector<64x32xf32> -> vector<64x32xf32>
    %15 = vector.extract_strided_slice %2 {offsets = [0, 0], sizes = [8, 32], strides = [1, 1]} : vector<16x32xf32> to vector<8x32xf32>
    %16 = vector.extract_strided_slice %5 {offsets = [0, 0], sizes = [8, 32], strides = [1, 1]} : vector<16x32xf32> to vector<8x32xf32>
    %17 = vector.extract_strided_slice %8 {offsets = [0, 0], sizes = [4, 32], strides = [1, 1]} : vector<8x32xf32> to vector<4x32xf32>
    %18 = vector.extract_strided_slice %11 {offsets = [0, 0], sizes = [32, 32], strides = [1, 1]} : vector<64x32xf32> to vector<32x32xf32>
    %19 = vector.extract_strided_slice %14 {offsets = [0, 0], sizes = [32, 32], strides = [1, 1]} : vector<64x32xf32> to vector<32x32xf32>
    %cst_23 = arith.constant dense<0.000000e+00> : vector<8x4xf32>
    %20 = tpu.matmul %15, %17, %cst_23 {dimension_numbers = #tpu.dot_dimension_numbers<[1], [1], [0], [0], [0, 0, 1, 0], [], []>} : vector<8x32xf32>, vector<4x32xf32>, vector<8x4xf32> -> vector<8x4xf32>
    %cst_24 = arith.constant 0.176776692 : f32
    %21 = vector.broadcast %cst_24 : f32 to vector<8x4xf32>
    %22 = arith.mulf %20, %21 : vector<8x4xf32>
    %23 = tpu.iota {dimensions = array<i32: 1>} : vector<8x4xi32>
    %c2_i32 = arith.constant 2 : i32
    %24 = arith.muli %arg0, %c2_i32 : i32
    %c0_i32 = arith.constant 0 : i32
    %25 = arith.addi %24, %c0_i32 : i32
    %26 = arith.index_cast %25 : i32 to index
    %27 = memref.load %arg1[%26] : memref<2xi32, #tpu.memory_space<smem>>
    %28 = vector.broadcast %27 : i32 to vector<8x4xi32>
    %29 = arith.cmpi slt, %23, %28 : vector<8x4xi32>
    %cst_25 = arith.constant -1.000000e+06 : f32
    %30 = vector.broadcast %cst_25 : f32 to vector<8x4xf32>
    %31 = arith.select %29, %22, %30 : vector<8x4xi1>, vector<8x4xf32>
    %cst_26 = arith.constant dense<0xFF800000> : vector<8xf32>
    %32 = vector.multi_reduction <maximumf>, %31, %cst_26 [1] : vector<8x4xf32> to vector<8xf32>
    %33 = vector.shape_cast %32 : vector<8xf32> to vector<8x1xf32>
    %34 = vector.broadcast %33 : vector<8x1xf32> to vector<8x4xf32>
    %35 = arith.cmpf oge, %31, %34 : vector<8x4xf32>
    %cst_27 = arith.constant -3.40282347E+38 : f32
    %36 = vector.broadcast %cst_27 : f32 to vector<8x4xf32>
    %37 = arith.select %35, %36, %31 : vector<8x4xi1>, vector<8x4xf32>
    %cst_28 = arith.constant dense<0xFF800000> : vector<8xf32>
    %38 = vector.multi_reduction <maximumf>, %37, %cst_28 [1] : vector<8x4xf32> to vector<8xf32>
    %39 = vector.shape_cast %38 : vector<8xf32> to vector<8x1xf32>
    %40 = vector.broadcast %39 : vector<8x1xf32> to vector<8x4xf32>
    %41 = arith.cmpf oge, %31, %40 : vector<8x4xf32>
    %cst_29 = arith.constant -1.000000e+06 : f32
    %42 = vector.broadcast %cst_29 : f32 to vector<8x4xf32>
    %43 = arith.select %41, %31, %42 : vector<8x4xi1>, vector<8x4xf32>
    %cst_30 = arith.constant dense<0xFF800000> : vector<8xf32>
    %44 = vector.multi_reduction <maximumf>, %43, %cst_30 [1] : vector<8x4xf32> to vector<8xf32>
    %45 = vector.shape_cast %44 : vector<8xf32> to vector<8x1xf32>
    %46 = vector.broadcast %45 : vector<8x1xf32> to vector<8x4xf32>
    %47 = arith.subf %43, %46 : vector<8x4xf32>
    %48 = math.exp %47 : vector<8x4xf32>
    %cst_31 = arith.constant dense<0.000000e+00> : vector<8xf32>
    %49 = vector.multi_reduction <add>, %48, %cst_31 [1] : vector<8x4xf32> to vector<8xf32>
    %50 = vector.shape_cast %49 : vector<8xf32> to vector<8x1xf32>
    %51 = tpu.reciprocal %50 {approx = true} : vector<8x1xf32> -> vector<8x1xf32>
    %52 = vector.broadcast %51 : vector<8x1xf32> to vector<8x4xf32>
    %53 = arith.mulf %48, %52 : vector<8x4xf32>
    %cst_32 = arith.constant dense<0.000000e+00> : vector<8x32xf32>
    %54 = tpu.matmul %16, %18, %cst_32 {dimension_numbers = #tpu.dot_dimension_numbers<[1], [1], [0], [0], [0, 0, 1, 0], [], []>} : vector<8x32xf32>, vector<32x32xf32>, vector<8x32xf32> -> vector<8x32xf32>
    %cst_33 = arith.constant 0.176776692 : f32
    %55 = vector.broadcast %cst_33 : f32 to vector<8x32xf32>
    %56 = arith.mulf %54, %55 : vector<8x32xf32>
    %57 = tpu.iota {dimensions = array<i32: 1>} : vector<8x32xi32>
    %cst_34 = arith.constant 0.000000e+00 : f32
    %58 = vector.broadcast %cst_34 : f32 to vector<8x32xf32>
    %c0_i32_35 = arith.constant 0 : i32
    %59 = vector.broadcast %c0_i32_35 : i32 to vector<8x32xi32>
    %60 = arith.cmpi sge, %57, %59 : vector<8x32xi32>
    %c8_i32 = arith.constant 8 : i32
    %61 = vector.broadcast %c8_i32 : i32 to vector<8x32xi32>
    %62 = arith.cmpi slt, %57, %61 : vector<8x32xi32>
    %63 = arith.andi %60, %62 : vector<8x32xi1>
    %cst_36 = arith.constant -3.40282347E+38 : f32
    %64 = vector.broadcast %cst_36 : f32 to vector<8x32xf32>
    %65 = arith.select %63, %56, %64 : vector<8x32xi1>, vector<8x32xf32>
    %cst_37 = arith.constant dense<0xFF800000> : vector<8xf32>
    %66 = vector.multi_reduction <maximumf>, %65, %cst_37 [1] : vector<8x32xf32> to vector<8xf32>
    %67 = vector.shape_cast %66 : vector<8xf32> to vector<8x1xf32>
    %68 = vector.broadcast %67 : vector<8x1xf32> to vector<8x32xf32>
    %69 = arith.cmpf oge, %65, %68 : vector<8x32xf32>
    %cst_38 = arith.constant -3.40282347E+38 : f32
    %70 = vector.broadcast %cst_38 : f32 to vector<8x32xf32>
    %71 = arith.select %69, %70, %65 : vector<8x32xi1>, vector<8x32xf32>
    %cst_39 = arith.constant dense<0xFF800000> : vector<8xf32>
    %72 = vector.multi_reduction <maximumf>, %71, %cst_39 [1] : vector<8x32xf32> to vector<8xf32>
    %73 = vector.shape_cast %72 : vector<8xf32> to vector<8x1xf32>
    %74 = vector.broadcast %73 : vector<8x1xf32> to vector<8x32xf32>
    %75 = arith.cmpf oge, %71, %74 : vector<8x32xf32>
    %cst_40 = arith.constant -3.40282347E+38 : f32
    %76 = vector.broadcast %cst_40 : f32 to vector<8x32xf32>
    %77 = arith.select %75, %76, %71 : vector<8x32xi1>, vector<8x32xf32>
    %cst_41 = arith.constant dense<0xFF800000> : vector<8xf32>
    %78 = vector.multi_reduction <maximumf>, %77, %cst_41 [1] : vector<8x32xf32> to vector<8xf32>
    %79 = vector.shape_cast %78 : vector<8xf32> to vector<8x1xf32>
    %80 = vector.broadcast %79 : vector<8x1xf32> to vector<8x32xf32>
    %81 = arith.cmpf oge, %65, %80 : vector<8x32xf32>
    %cst_42 = arith.constant -1.000000e+06 : f32
    %82 = vector.broadcast %cst_42 : f32 to vector<8x32xf32>
    %83 = arith.select %81, %65, %82 : vector<8x32xi1>, vector<8x32xf32>
    %cst_43 = arith.constant dense<0xFF800000> : vector<8xf32>
    %84 = vector.multi_reduction <maximumf>, %83, %cst_43 [1] : vector<8x32xf32> to vector<8xf32>
    %85 = vector.shape_cast %84 : vector<8xf32> to vector<8x1xf32>
    %86 = vector.broadcast %85 : vector<8x1xf32> to vector<8x32xf32>
    %87 = arith.subf %83, %86 : vector<8x32xf32>
    %88 = math.exp %87 : vector<8x32xf32>
    %cst_44 = arith.constant 0.000000e+00 : f32
    %89 = vector.broadcast %cst_44 : f32 to vector<8x32xf32>
    %90 = arith.select %63, %88, %89 : vector<8x32xi1>, vector<8x32xf32>
    %cst_45 = arith.constant dense<0.000000e+00> : vector<8xf32>
    %91 = vector.multi_reduction <add>, %90, %cst_45 [1] : vector<8x32xf32> to vector<8xf32>
    %92 = vector.shape_cast %91 : vector<8xf32> to vector<8x1xf32>
    %93 = tpu.reciprocal %92 {approx = true} : vector<8x1xf32> -> vector<8x1xf32>
    %94 = vector.broadcast %93 : vector<8x1xf32> to vector<8x32xf32>
    %95 = arith.mulf %90, %94 : vector<8x32xf32>
    %96 = vector.extract_strided_slice %53 {offsets = [0, 0], sizes = [8, 1], strides = [1, 1]} : vector<8x4xf32> to vector<8x1xf32>
    %97 = vector.broadcast %96 : vector<8x1xf32> to vector<8x32xf32>
    %98 = arith.mulf %95, %97 : vector<8x32xf32>
    %99 = arith.addf %58, %98 : vector<8x32xf32>
    %c8_i32_46 = arith.constant 8 : i32
    %100 = vector.broadcast %c8_i32_46 : i32 to vector<8x32xi32>
    %101 = arith.cmpi sge, %57, %100 : vector<8x32xi32>
    %c16_i32 = arith.constant 16 : i32
    %102 = vector.broadcast %c16_i32 : i32 to vector<8x32xi32>
    %103 = arith.cmpi slt, %57, %102 : vector<8x32xi32>
    %104 = arith.andi %101, %103 : vector<8x32xi1>
    %cst_47 = arith.constant -3.40282347E+38 : f32
    %105 = vector.broadcast %cst_47 : f32 to vector<8x32xf32>
    %106 = arith.select %104, %56, %105 : vector<8x32xi1>, vector<8x32xf32>
    %cst_48 = arith.constant dense<0xFF800000> : vector<8xf32>
    %107 = vector.multi_reduction <maximumf>, %106, %cst_48 [1] : vector<8x32xf32> to vector<8xf32>
    %108 = vector.shape_cast %107 : vector<8xf32> to vector<8x1xf32>
    %109 = vector.broadcast %108 : vector<8x1xf32> to vector<8x32xf32>
    %110 = arith.cmpf oge, %106, %109 : vector<8x32xf32>
    %cst_49 = arith.constant -3.40282347E+38 : f32
    %111 = vector.broadcast %cst_49 : f32 to vector<8x32xf32>
    %112 = arith.select %110, %111, %106 : vector<8x32xi1>, vector<8x32xf32>
    %cst_50 = arith.constant dense<0xFF800000> : vector<8xf32>
    %113 = vector.multi_reduction <maximumf>, %112, %cst_50 [1] : vector<8x32xf32> to vector<8xf32>
    %114 = vector.shape_cast %113 : vector<8xf32> to vector<8x1xf32>
    %115 = vector.broadcast %114 : vector<8x1xf32> to vector<8x32xf32>
    %116 = arith.cmpf oge, %112, %115 : vector<8x32xf32>
    %cst_51 = arith.constant -3.40282347E+38 : f32
    %117 = vector.broadcast %cst_51 : f32 to vector<8x32xf32>
    %118 = arith.select %116, %117, %112 : vector<8x32xi1>, vector<8x32xf32>
    %cst_52 = arith.constant dense<0xFF800000> : vector<8xf32>
    %119 = vector.multi_reduction <maximumf>, %118, %cst_52 [1] : vector<8x32xf32> to vector<8xf32>
    %120 = vector.shape_cast %119 : vector<8xf32> to vector<8x1xf32>
    %121 = vector.broadcast %120 : vector<8x1xf32> to vector<8x32xf32>
    %122 = arith.cmpf oge, %106, %121 : vector<8x32xf32>
    %cst_53 = arith.constant -1.000000e+06 : f32
    %123 = vector.broadcast %cst_53 : f32 to vector<8x32xf32>
    %124 = arith.select %122, %106, %123 : vector<8x32xi1>, vector<8x32xf32>
    %cst_54 = arith.constant dense<0xFF800000> : vector<8xf32>
    %125 = vector.multi_reduction <maximumf>, %124, %cst_54 [1] : vector<8x32xf32> to vector<8xf32>
    %126 = vector.shape_cast %125 : vector<8xf32> to vector<8x1xf32>
    %127 = vector.broadcast %126 : vector<8x1xf32> to vector<8x32xf32>
    %128 = arith.subf %124, %127 : vector<8x32xf32>
    %129 = math.exp %128 : vector<8x32xf32>
    %cst_55 = arith.constant 0.000000e+00 : f32
    %130 = vector.broadcast %cst_55 : f32 to vector<8x32xf32>
    %131 = arith.select %104, %129, %130 : vector<8x32xi1>, vector<8x32xf32>
    %cst_56 = arith.constant dense<0.000000e+00> : vector<8xf32>
    %132 = vector.multi_reduction <add>, %131, %cst_56 [1] : vector<8x32xf32> to vector<8xf32>
    %133 = vector.shape_cast %132 : vector<8xf32> to vector<8x1xf32>
    %134 = tpu.reciprocal %133 {approx = true} : vector<8x1xf32> -> vector<8x1xf32>
    %135 = vector.broadcast %134 : vector<8x1xf32> to vector<8x32xf32>
    %136 = arith.mulf %131, %135 : vector<8x32xf32>
    %137 = vector.extract_strided_slice %53 {offsets = [0, 1], sizes = [8, 1], strides = [1, 1]} : vector<8x4xf32> to vector<8x1xf32>
    %138 = vector.broadcast %137 : vector<8x1xf32> to vector<8x32xf32>
    %139 = arith.mulf %136, %138 : vector<8x32xf32>
    %140 = arith.addf %99, %139 : vector<8x32xf32>
    %c16_i32_57 = arith.constant 16 : i32
    %141 = vector.broadcast %c16_i32_57 : i32 to vector<8x32xi32>
    %142 = arith.cmpi sge, %57, %141 : vector<8x32xi32>
    %c24_i32 = arith.constant 24 : i32
    %143 = vector.broadcast %c24_i32 : i32 to vector<8x32xi32>
    %144 = arith.cmpi slt, %57, %143 : vector<8x32xi32>
    %145 = arith.andi %142, %144 : vector<8x32xi1>
    %cst_58 = arith.constant -3.40282347E+38 : f32
    %146 = vector.broadcast %cst_58 : f32 to vector<8x32xf32>
    %147 = arith.select %145, %56, %146 : vector<8x32xi1>, vector<8x32xf32>
    %cst_59 = arith.constant dense<0xFF800000> : vector<8xf32>
    %148 = vector.multi_reduction <maximumf>, %147, %cst_59 [1] : vector<8x32xf32> to vector<8xf32>
    %149 = vector.shape_cast %148 : vector<8xf32> to vector<8x1xf32>
    %150 = vector.broadcast %149 : vector<8x1xf32> to vector<8x32xf32>
    %151 = arith.cmpf oge, %147, %150 : vector<8x32xf32>
    %cst_60 = arith.constant -3.40282347E+38 : f32
    %152 = vector.broadcast %cst_60 : f32 to vector<8x32xf32>
    %153 = arith.select %151, %152, %147 : vector<8x32xi1>, vector<8x32xf32>
    %cst_61 = arith.constant dense<0xFF800000> : vector<8xf32>
    %154 = vector.multi_reduction <maximumf>, %153, %cst_61 [1] : vector<8x32xf32> to vector<8xf32>
    %155 = vector.shape_cast %154 : vector<8xf32> to vector<8x1xf32>
    %156 = vector.broadcast %155 : vector<8x1xf32> to vector<8x32xf32>
    %157 = arith.cmpf oge, %153, %156 : vector<8x32xf32>
    %cst_62 = arith.constant -3.40282347E+38 : f32
    %158 = vector.broadcast %cst_62 : f32 to vector<8x32xf32>
    %159 = arith.select %157, %158, %153 : vector<8x32xi1>, vector<8x32xf32>
    %cst_63 = arith.constant dense<0xFF800000> : vector<8xf32>
    %160 = vector.multi_reduction <maximumf>, %159, %cst_63 [1] : vector<8x32xf32> to vector<8xf32>
    %161 = vector.shape_cast %160 : vector<8xf32> to vector<8x1xf32>
    %162 = vector.broadcast %161 : vector<8x1xf32> to vector<8x32xf32>
    %163 = arith.cmpf oge, %147, %162 : vector<8x32xf32>
    %cst_64 = arith.constant -1.000000e+06 : f32
    %164 = vector.broadcast %cst_64 : f32 to vector<8x32xf32>
    %165 = arith.select %163, %147, %164 : vector<8x32xi1>, vector<8x32xf32>
    %cst_65 = arith.constant dense<0xFF800000> : vector<8xf32>
    %166 = vector.multi_reduction <maximumf>, %165, %cst_65 [1] : vector<8x32xf32> to vector<8xf32>
    %167 = vector.shape_cast %166 : vector<8xf32> to vector<8x1xf32>
    %168 = vector.broadcast %167 : vector<8x1xf32> to vector<8x32xf32>
    %169 = arith.subf %165, %168 : vector<8x32xf32>
    %170 = math.exp %169 : vector<8x32xf32>
    %cst_66 = arith.constant 0.000000e+00 : f32
    %171 = vector.broadcast %cst_66 : f32 to vector<8x32xf32>
    %172 = arith.select %145, %170, %171 : vector<8x32xi1>, vector<8x32xf32>
    %cst_67 = arith.constant dense<0.000000e+00> : vector<8xf32>
    %173 = vector.multi_reduction <add>, %172, %cst_67 [1] : vector<8x32xf32> to vector<8xf32>
    %174 = vector.shape_cast %173 : vector<8xf32> to vector<8x1xf32>
    %175 = tpu.reciprocal %174 {approx = true} : vector<8x1xf32> -> vector<8x1xf32>
    %176 = vector.broadcast %175 : vector<8x1xf32> to vector<8x32xf32>
    %177 = arith.mulf %172, %176 : vector<8x32xf32>
    %178 = vector.extract_strided_slice %53 {offsets = [0, 2], sizes = [8, 1], strides = [1, 1]} : vector<8x4xf32> to vector<8x1xf32>
    %179 = vector.broadcast %178 : vector<8x1xf32> to vector<8x32xf32>
    %180 = arith.mulf %177, %179 : vector<8x32xf32>
    %181 = arith.addf %140, %180 : vector<8x32xf32>
    %c24_i32_68 = arith.constant 24 : i32
    %182 = vector.broadcast %c24_i32_68 : i32 to vector<8x32xi32>
    %183 = arith.cmpi sge, %57, %182 : vector<8x32xi32>
    %c32_i32 = arith.constant 32 : i32
    %184 = vector.broadcast %c32_i32 : i32 to vector<8x32xi32>
    %185 = arith.cmpi slt, %57, %184 : vector<8x32xi32>
    %186 = arith.andi %183, %185 : vector<8x32xi1>
    %cst_69 = arith.constant -3.40282347E+38 : f32
    %187 = vector.broadcast %cst_69 : f32 to vector<8x32xf32>
    %188 = arith.select %186, %56, %187 : vector<8x32xi1>, vector<8x32xf32>
    %cst_70 = arith.constant dense<0xFF800000> : vector<8xf32>
    %189 = vector.multi_reduction <maximumf>, %188, %cst_70 [1] : vector<8x32xf32> to vector<8xf32>
    %190 = vector.shape_cast %189 : vector<8xf32> to vector<8x1xf32>
    %191 = vector.broadcast %190 : vector<8x1xf32> to vector<8x32xf32>
    %192 = arith.cmpf oge, %188, %191 : vector<8x32xf32>
    %cst_71 = arith.constant -3.40282347E+38 : f32
    %193 = vector.broadcast %cst_71 : f32 to vector<8x32xf32>
    %194 = arith.select %192, %193, %188 : vector<8x32xi1>, vector<8x32xf32>
    %cst_72 = arith.constant dense<0xFF800000> : vector<8xf32>
    %195 = vector.multi_reduction <maximumf>, %194, %cst_72 [1] : vector<8x32xf32> to vector<8xf32>
    %196 = vector.shape_cast %195 : vector<8xf32> to vector<8x1xf32>
    %197 = vector.broadcast %196 : vector<8x1xf32> to vector<8x32xf32>
    %198 = arith.cmpf oge, %194, %197 : vector<8x32xf32>
    %cst_73 = arith.constant -3.40282347E+38 : f32
    %199 = vector.broadcast %cst_73 : f32 to vector<8x32xf32>
    %200 = arith.select %198, %199, %194 : vector<8x32xi1>, vector<8x32xf32>
    %cst_74 = arith.constant dense<0xFF800000> : vector<8xf32>
    %201 = vector.multi_reduction <maximumf>, %200, %cst_74 [1] : vector<8x32xf32> to vector<8xf32>
    %202 = vector.shape_cast %201 : vector<8xf32> to vector<8x1xf32>
    %203 = vector.broadcast %202 : vector<8x1xf32> to vector<8x32xf32>
    %204 = arith.cmpf oge, %188, %203 : vector<8x32xf32>
    %cst_75 = arith.constant -1.000000e+06 : f32
    %205 = vector.broadcast %cst_75 : f32 to vector<8x32xf32>
    %206 = arith.select %204, %188, %205 : vector<8x32xi1>, vector<8x32xf32>
    %cst_76 = arith.constant dense<0xFF800000> : vector<8xf32>
    %207 = vector.multi_reduction <maximumf>, %206, %cst_76 [1] : vector<8x32xf32> to vector<8xf32>
    %208 = vector.shape_cast %207 : vector<8xf32> to vector<8x1xf32>
    %209 = vector.broadcast %208 : vector<8x1xf32> to vector<8x32xf32>
    %210 = arith.subf %206, %209 : vector<8x32xf32>
    %211 = math.exp %210 : vector<8x32xf32>
    %cst_77 = arith.constant 0.000000e+00 : f32
    %212 = vector.broadcast %cst_77 : f32 to vector<8x32xf32>
    %213 = arith.select %186, %211, %212 : vector<8x32xi1>, vector<8x32xf32>
    %cst_78 = arith.constant dense<0.000000e+00> : vector<8xf32>
    %214 = vector.multi_reduction <add>, %213, %cst_78 [1] : vector<8x32xf32> to vector<8xf32>
    %215 = vector.shape_cast %214 : vector<8xf32> to vector<8x1xf32>
    %216 = tpu.reciprocal %215 {approx = true} : vector<8x1xf32> -> vector<8x1xf32>
    %217 = vector.broadcast %216 : vector<8x1xf32> to vector<8x32xf32>
    %218 = arith.mulf %213, %217 : vector<8x32xf32>
    %219 = vector.extract_strided_slice %53 {offsets = [0, 3], sizes = [8, 1], strides = [1, 1]} : vector<8x4xf32> to vector<8x1xf32>
    %220 = vector.broadcast %219 : vector<8x1xf32> to vector<8x32xf32>
    %221 = arith.mulf %218, %220 : vector<8x32xf32>
    %222 = arith.addf %181, %221 : vector<8x32xf32>
    %cst_79 = arith.constant dense<0.000000e+00> : vector<8x32xf32>
    %223 = tpu.matmul %222, %19, %cst_79 {dimension_numbers = #tpu.dot_dimension_numbers<[1], [0], [0], [1], [0, 0, 1, 1], [], []>} : vector<8x32xf32>, vector<32x32xf32>, vector<8x32xf32> -> vector<8x32xf32>
    %c0_80 = arith.constant 0 : index
    %c0_81 = arith.constant 0 : index
    %224 = vector.load %arg13[%c0_80, %c0_81] : memref<16x32xf32, #tpu.memory_space<vmem>>, vector<8x32xf32>
    tpu.vector_store %arg13[%c0_80, %c0_81], %223 {strides = array<i32>} : memref<16x32xf32, #tpu.memory_space<vmem>>, vector<8x32xf32>,
    %225 = vector.extract_strided_slice %2 {offsets = [8, 0], sizes = [8, 32], strides = [1, 1]} : vector<16x32xf32> to vector<8x32xf32>
    %226 = vector.extract_strided_slice %5 {offsets = [8, 0], sizes = [8, 32], strides = [1, 1]} : vector<16x32xf32> to vector<8x32xf32>
    %227 = vector.extract_strided_slice %8 {offsets = [4, 0], sizes = [4, 32], strides = [1, 1]} : vector<8x32xf32> to vector<4x32xf32>
    %228 = vector.extract_strided_slice %11 {offsets = [32, 0], sizes = [32, 32], strides = [1, 1]} : vector<64x32xf32> to vector<32x32xf32>
    %229 = vector.extract_strided_slice %14 {offsets = [32, 0], sizes = [32, 32], strides = [1, 1]} : vector<64x32xf32> to vector<32x32xf32>
    %cst_82 = arith.constant dense<0.000000e+00> : vector<8x4xf32>
    %230 = tpu.matmul %225, %227, %cst_82 {dimension_numbers = #tpu.dot_dimension_numbers<[1], [1], [0], [0], [0, 0, 1, 0], [], []>} : vector<8x32xf32>, vector<4x32xf32>, vector<8x4xf32> -> vector<8x4xf32>
    %cst_83 = arith.constant 0.176776692 : f32
    %231 = vector.broadcast %cst_83 : f32 to vector<8x4xf32>
    %232 = arith.mulf %230, %231 : vector<8x4xf32>
    %233 = tpu.iota {dimensions = array<i32: 1>} : vector<8x4xi32>
    %c2_i32_84 = arith.constant 2 : i32
    %234 = arith.muli %arg0, %c2_i32_84 : i32
    %c1_i32 = arith.constant 1 : i32
    %235 = arith.addi %234, %c1_i32 : i32
    %236 = arith.index_cast %235 : i32 to index
    %237 = memref.load %arg1[%236] : memref<2xi32, #tpu.memory_space<smem>>
    %238 = vector.broadcast %237 : i32 to vector<8x4xi32>
    %239 = arith.cmpi slt, %233, %238 : vector<8x4xi32>
    %cst_85 = arith.constant -1.000000e+06 : f32
    %240 = vector.broadcast %cst_85 : f32 to vector<8x4xf32>
    %241 = arith.select %239, %232, %240 : vector<8x4xi1>, vector<8x4xf32>
    %cst_86 = arith.constant dense<0xFF800000> : vector<8xf32>
    %242 = vector.multi_reduction <maximumf>, %241, %cst_86 [1] : vector<8x4xf32> to vector<8xf32>
    %243 = vector.shape_cast %242 : vector<8xf32> to vector<8x1xf32>
    %244 = vector.broadcast %243 : vector<8x1xf32> to vector<8x4xf32>
    %245 = arith.cmpf oge, %241, %244 : vector<8x4xf32>
    %cst_87 = arith.constant -3.40282347E+38 : f32
    %246 = vector.broadcast %cst_87 : f32 to vector<8x4xf32>
    %247 = arith.select %245, %246, %241 : vector<8x4xi1>, vector<8x4xf32>
    %cst_88 = arith.constant dense<0xFF800000> : vector<8xf32>
    %248 = vector.multi_reduction <maximumf>, %247, %cst_88 [1] : vector<8x4xf32> to vector<8xf32>
    %249 = vector.shape_cast %248 : vector<8xf32> to vector<8x1xf32>
    %250 = vector.broadcast %249 : vector<8x1xf32> to vector<8x4xf32>
    %251 = arith.cmpf oge, %241, %250 : vector<8x4xf32>
    %cst_89 = arith.constant -1.000000e+06 : f32
    %252 = vector.broadcast %cst_89 : f32 to vector<8x4xf32>
    %253 = arith.select %251, %241, %252 : vector<8x4xi1>, vector<8x4xf32>
    %cst_90 = arith.constant dense<0xFF800000> : vector<8xf32>
    %254 = vector.multi_reduction <maximumf>, %253, %cst_90 [1] : vector<8x4xf32> to vector<8xf32>
    %255 = vector.shape_cast %254 : vector<8xf32> to vector<8x1xf32>
    %256 = vector.broadcast %255 : vector<8x1xf32> to vector<8x4xf32>
    %257 = arith.subf %253, %256 : vector<8x4xf32>
    %258 = math.exp %257 : vector<8x4xf32>
    %cst_91 = arith.constant dense<0.000000e+00> : vector<8xf32>
    %259 = vector.multi_reduction <add>, %258, %cst_91 [1] : vector<8x4xf32> to vector<8xf32>
    %260 = vector.shape_cast %259 : vector<8xf32> to vector<8x1xf32>
    %261 = tpu.reciprocal %260 {approx = true} : vector<8x1xf32> -> vector<8x1xf32>
    %262 = vector.broadcast %261 : vector<8x1xf32> to vector<8x4xf32>
    %263 = arith.mulf %258, %262 : vector<8x4xf32>
    %cst_92 = arith.constant dense<0.000000e+00> : vector<8x32xf32>
    %264 = tpu.matmul %226, %228, %cst_92 {dimension_numbers = #tpu.dot_dimension_numbers<[1], [1], [0], [0], [0, 0, 1, 0], [], []>} : vector<8x32xf32>, vector<32x32xf32>, vector<8x32xf32> -> vector<8x32xf32>
    %cst_93 = arith.constant 0.176776692 : f32
    %265 = vector.broadcast %cst_93 : f32 to vector<8x32xf32>
    %266 = arith.mulf %264, %265 : vector<8x32xf32>
    %267 = tpu.iota {dimensions = array<i32: 1>} : vector<8x32xi32>
    %cst_94 = arith.constant 0.000000e+00 : f32
    %268 = vector.broadcast %cst_94 : f32 to vector<8x32xf32>
    %c0_i32_95 = arith.constant 0 : i32
    %269 = vector.broadcast %c0_i32_95 : i32 to vector<8x32xi32>
    %270 = arith.cmpi sge, %267, %269 : vector<8x32xi32>
    %c8_i32_96 = arith.constant 8 : i32
    %271 = vector.broadcast %c8_i32_96 : i32 to vector<8x32xi32>
    %272 = arith.cmpi slt, %267, %271 : vector<8x32xi32>
    %273 = arith.andi %270, %272 : vector<8x32xi1>
    %cst_97 = arith.constant -3.40282347E+38 : f32
    %274 = vector.broadcast %cst_97 : f32 to vector<8x32xf32>
    %275 = arith.select %273, %266, %274 : vector<8x32xi1>, vector<8x32xf32>
    %cst_98 = arith.constant dense<0xFF800000> : vector<8xf32>
    %276 = vector.multi_reduction <maximumf>, %275, %cst_98 [1] : vector<8x32xf32> to vector<8xf32>
    %277 = vector.shape_cast %276 : vector<8xf32> to vector<8x1xf32>
    %278 = vector.broadcast %277 : vector<8x1xf32> to vector<8x32xf32>
    %279 = arith.cmpf oge, %275, %278 : vector<8x32xf32>
    %cst_99 = arith.constant -3.40282347E+38 : f32
    %280 = vector.broadcast %cst_99 : f32 to vector<8x32xf32>
    %281 = arith.select %279, %280, %275 : vector<8x32xi1>, vector<8x32xf32>
    %cst_100 = arith.constant dense<0xFF800000> : vector<8xf32>
    %282 = vector.multi_reduction <maximumf>, %281, %cst_100 [1] : vector<8x32xf32> to vector<8xf32>
    %283 = vector.shape_cast %282 : vector<8xf32> to vector<8x1xf32>
    %284 = vector.broadcast %283 : vector<8x1xf32> to vector<8x32xf32>
    %285 = arith.cmpf oge, %281, %284 : vector<8x32xf32>
    %cst_101 = arith.constant -3.40282347E+38 : f32
    %286 = vector.broadcast %cst_101 : f32 to vector<8x32xf32>
    %287 = arith.select %285, %286, %281 : vector<8x32xi1>, vector<8x32xf32>
    %cst_102 = arith.constant dense<0xFF800000> : vector<8xf32>
    %288 = vector.multi_reduction <maximumf>, %287, %cst_102 [1] : vector<8x32xf32> to vector<8xf32>
    %289 = vector.shape_cast %288 : vector<8xf32> to vector<8x1xf32>
    %290 = vector.broadcast %289 : vector<8x1xf32> to vector<8x32xf32>
    %291 = arith.cmpf oge, %275, %290 : vector<8x32xf32>
    %cst_103 = arith.constant -1.000000e+06 : f32
    %292 = vector.broadcast %cst_103 : f32 to vector<8x32xf32>
    %293 = arith.select %291, %275, %292 : vector<8x32xi1>, vector<8x32xf32>
    %cst_104 = arith.constant dense<0xFF800000> : vector<8xf32>
    %294 = vector.multi_reduction <maximumf>, %293, %cst_104 [1] : vector<8x32xf32> to vector<8xf32>
    %295 = vector.shape_cast %294 : vector<8xf32> to vector<8x1xf32>
    %296 = vector.broadcast %295 : vector<8x1xf32> to vector<8x32xf32>
    %297 = arith.subf %293, %296 : vector<8x32xf32>
    %298 = math.exp %297 : vector<8x32xf32>
    %cst_105 = arith.constant 0.000000e+00 : f32
    %299 = vector.broadcast %cst_105 : f32 to vector<8x32xf32>
    %300 = arith.select %273, %298, %299 : vector<8x32xi1>, vector<8x32xf32>
    %cst_106 = arith.constant dense<0.000000e+00> : vector<8xf32>
    %301 = vector.multi_reduction <add>, %300, %cst_106 [1] : vector<8x32xf32> to vector<8xf32>
    %302 = vector.shape_cast %301 : vector<8xf32> to vector<8x1xf32>
    %303 = tpu.reciprocal %302 {approx = true} : vector<8x1xf32> -> vector<8x1xf32>
    %304 = vector.broadcast %303 : vector<8x1xf32> to vector<8x32xf32>
    %305 = arith.mulf %300, %304 : vector<8x32xf32>
    %306 = vector.extract_strided_slice %263 {offsets = [0, 0], sizes = [8, 1], strides = [1, 1]} : vector<8x4xf32> to vector<8x1xf32>
    %307 = vector.broadcast %306 : vector<8x1xf32> to vector<8x32xf32>
    %308 = arith.mulf %305, %307 : vector<8x32xf32>
    %309 = arith.addf %268, %308 : vector<8x32xf32>
    %c8_i32_107 = arith.constant 8 : i32
    %310 = vector.broadcast %c8_i32_107 : i32 to vector<8x32xi32>
    %311 = arith.cmpi sge, %267, %310 : vector<8x32xi32>
    %c16_i32_108 = arith.constant 16 : i32
    %312 = vector.broadcast %c16_i32_108 : i32 to vector<8x32xi32>
    %313 = arith.cmpi slt, %267, %312 : vector<8x32xi32>
    %314 = arith.andi %311, %313 : vector<8x32xi1>
    %cst_109 = arith.constant -3.40282347E+38 : f32
    %315 = vector.broadcast %cst_109 : f32 to vector<8x32xf32>
    %316 = arith.select %314, %266, %315 : vector<8x32xi1>, vector<8x32xf32>
    %cst_110 = arith.constant dense<0xFF800000> : vector<8xf32>
    %317 = vector.multi_reduction <maximumf>, %316, %cst_110 [1] : vector<8x32xf32> to vector<8xf32>
    %318 = vector.shape_cast %317 : vector<8xf32> to vector<8x1xf32>
    %319 = vector.broadcast %318 : vector<8x1xf32> to vector<8x32xf32>
    %320 = arith.cmpf oge, %316, %319 : vector<8x32xf32>
    %cst_111 = arith.constant -3.40282347E+38 : f32
    %321 = vector.broadcast %cst_111 : f32 to vector<8x32xf32>
    %322 = arith.select %320, %321, %316 : vector<8x32xi1>, vector<8x32xf32>
    %cst_112 = arith.constant dense<0xFF800000> : vector<8xf32>
    %323 = vector.multi_reduction <maximumf>, %322, %cst_112 [1] : vector<8x32xf32> to vector<8xf32>
    %324 = vector.shape_cast %323 : vector<8xf32> to vector<8x1xf32>
    %325 = vector.broadcast %324 : vector<8x1xf32> to vector<8x32xf32>
    %326 = arith.cmpf oge, %322, %325 : vector<8x32xf32>
    %cst_113 = arith.constant -3.40282347E+38 : f32
    %327 = vector.broadcast %cst_113 : f32 to vector<8x32xf32>
    %328 = arith.select %326, %327, %322 : vector<8x32xi1>, vector<8x32xf32>
    %cst_114 = arith.constant dense<0xFF800000> : vector<8xf32>
    %329 = vector.multi_reduction <maximumf>, %328, %cst_114 [1] : vector<8x32xf32> to vector<8xf32>
    %330 = vector.shape_cast %329 : vector<8xf32> to vector<8x1xf32>
    %331 = vector.broadcast %330 : vector<8x1xf32> to vector<8x32xf32>
    %332 = arith.cmpf oge, %316, %331 : vector<8x32xf32>
    %cst_115 = arith.constant -1.000000e+06 : f32
    %333 = vector.broadcast %cst_115 : f32 to vector<8x32xf32>
    %334 = arith.select %332, %316, %333 : vector<8x32xi1>, vector<8x32xf32>
    %cst_116 = arith.constant dense<0xFF800000> : vector<8xf32>
    %335 = vector.multi_reduction <maximumf>, %334, %cst_116 [1] : vector<8x32xf32> to vector<8xf32>
    %336 = vector.shape_cast %335 : vector<8xf32> to vector<8x1xf32>
    %337 = vector.broadcast %336 : vector<8x1xf32> to vector<8x32xf32>
    %338 = arith.subf %334, %337 : vector<8x32xf32>
    %339 = math.exp %338 : vector<8x32xf32>
    %cst_117 = arith.constant 0.000000e+00 : f32
    %340 = vector.broadcast %cst_117 : f32 to vector<8x32xf32>
    %341 = arith.select %314, %339, %340 : vector<8x32xi1>, vector<8x32xf32>
    %cst_118 = arith.constant dense<0.000000e+00> : vector<8xf32>
    %342 = vector.multi_reduction <add>, %341, %cst_118 [1] : vector<8x32xf32> to vector<8xf32>
    %343 = vector.shape_cast %342 : vector<8xf32> to vector<8x1xf32>
    %344 = tpu.reciprocal %343 {approx = true} : vector<8x1xf32> -> vector<8x1xf32>
    %345 = vector.broadcast %344 : vector<8x1xf32> to vector<8x32xf32>
    %346 = arith.mulf %341, %345 : vector<8x32xf32>
    %347 = vector.extract_strided_slice %263 {offsets = [0, 1], sizes = [8, 1], strides = [1, 1]} : vector<8x4xf32> to vector<8x1xf32>
    %348 = vector.broadcast %347 : vector<8x1xf32> to vector<8x32xf32>
    %349 = arith.mulf %346, %348 : vector<8x32xf32>
    %350 = arith.addf %309, %349 : vector<8x32xf32>
    %c16_i32_119 = arith.constant 16 : i32
    %351 = vector.broadcast %c16_i32_119 : i32 to vector<8x32xi32>
    %352 = arith.cmpi sge, %267, %351 : vector<8x32xi32>
    %c24_i32_120 = arith.constant 24 : i32
    %353 = vector.broadcast %c24_i32_120 : i32 to vector<8x32xi32>
    %354 = arith.cmpi slt, %267, %353 : vector<8x32xi32>
    %355 = arith.andi %352, %354 : vector<8x32xi1>
    %cst_121 = arith.constant -3.40282347E+38 : f32
    %356 = vector.broadcast %cst_121 : f32 to vector<8x32xf32>
    %357 = arith.select %355, %266, %356 : vector<8x32xi1>, vector<8x32xf32>
    %cst_122 = arith.constant dense<0xFF800000> : vector<8xf32>
    %358 = vector.multi_reduction <maximumf>, %357, %cst_122 [1] : vector<8x32xf32> to vector<8xf32>
    %359 = vector.shape_cast %358 : vector<8xf32> to vector<8x1xf32>
    %360 = vector.broadcast %359 : vector<8x1xf32> to vector<8x32xf32>
    %361 = arith.cmpf oge, %357, %360 : vector<8x32xf32>
    %cst_123 = arith.constant -3.40282347E+38 : f32
    %362 = vector.broadcast %cst_123 : f32 to vector<8x32xf32>
    %363 = arith.select %361, %362, %357 : vector<8x32xi1>, vector<8x32xf32>
    %cst_124 = arith.constant dense<0xFF800000> : vector<8xf32>
    %364 = vector.multi_reduction <maximumf>, %363, %cst_124 [1] : vector<8x32xf32> to vector<8xf32>
    %365 = vector.shape_cast %364 : vector<8xf32> to vector<8x1xf32>
    %366 = vector.broadcast %365 : vector<8x1xf32> to vector<8x32xf32>
    %367 = arith.cmpf oge, %363, %366 : vector<8x32xf32>
    %cst_125 = arith.constant -3.40282347E+38 : f32
    %368 = vector.broadcast %cst_125 : f32 to vector<8x32xf32>
    %369 = arith.select %367, %368, %363 : vector<8x32xi1>, vector<8x32xf32>
    %cst_126 = arith.constant dense<0xFF800000> : vector<8xf32>
    %370 = vector.multi_reduction <maximumf>, %369, %cst_126 [1] : vector<8x32xf32> to vector<8xf32>
    %371 = vector.shape_cast %370 : vector<8xf32> to vector<8x1xf32>
    %372 = vector.broadcast %371 : vector<8x1xf32> to vector<8x32xf32>
    %373 = arith.cmpf oge, %357, %372 : vector<8x32xf32>
    %cst_127 = arith.constant -1.000000e+06 : f32
    %374 = vector.broadcast %cst_127 : f32 to vector<8x32xf32>
    %375 = arith.select %373, %357, %374 : vector<8x32xi1>, vector<8x32xf32>
    %cst_128 = arith.constant dense<0xFF800000> : vector<8xf32>
    %376 = vector.multi_reduction <maximumf>, %375, %cst_128 [1] : vector<8x32xf32> to vector<8xf32>
    %377 = vector.shape_cast %376 : vector<8xf32> to vector<8x1xf32>
    %378 = vector.broadcast %377 : vector<8x1xf32> to vector<8x32xf32>
    %379 = arith.subf %375, %378 : vector<8x32xf32>
    %380 = math.exp %379 : vector<8x32xf32>
    %cst_129 = arith.constant 0.000000e+00 : f32
    %381 = vector.broadcast %cst_129 : f32 to vector<8x32xf32>
    %382 = arith.select %355, %380, %381 : vector<8x32xi1>, vector<8x32xf32>
    %cst_130 = arith.constant dense<0.000000e+00> : vector<8xf32>
    %383 = vector.multi_reduction <add>, %382, %cst_130 [1] : vector<8x32xf32> to vector<8xf32>
    %384 = vector.shape_cast %383 : vector<8xf32> to vector<8x1xf32>
    %385 = tpu.reciprocal %384 {approx = true} : vector<8x1xf32> -> vector<8x1xf32>
    %386 = vector.broadcast %385 : vector<8x1xf32> to vector<8x32xf32>
    %387 = arith.mulf %382, %386 : vector<8x32xf32>
    %388 = vector.extract_strided_slice %263 {offsets = [0, 2], sizes = [8, 1], strides = [1, 1]} : vector<8x4xf32> to vector<8x1xf32>
    %389 = vector.broadcast %388 : vector<8x1xf32> to vector<8x32xf32>
    %390 = arith.mulf %387, %389 : vector<8x32xf32>
    %391 = arith.addf %350, %390 : vector<8x32xf32>
    %c24_i32_131 = arith.constant 24 : i32
    %392 = vector.broadcast %c24_i32_131 : i32 to vector<8x32xi32>
    %393 = arith.cmpi sge, %267, %392 : vector<8x32xi32>
    %c32_i32_132 = arith.constant 32 : i32
    %394 = vector.broadcast %c32_i32_132 : i32 to vector<8x32xi32>
    %395 = arith.cmpi slt, %267, %394 : vector<8x32xi32>
    %396 = arith.andi %393, %395 : vector<8x32xi1>
    %cst_133 = arith.constant -3.40282347E+38 : f32
    %397 = vector.broadcast %cst_133 : f32 to vector<8x32xf32>
    %398 = arith.select %396, %266, %397 : vector<8x32xi1>, vector<8x32xf32>
    %cst_134 = arith.constant dense<0xFF800000> : vector<8xf32>
    %399 = vector.multi_reduction <maximumf>, %398, %cst_134 [1] : vector<8x32xf32> to vector<8xf32>
    %400 = vector.shape_cast %399 : vector<8xf32> to vector<8x1xf32>
    %401 = vector.broadcast %400 : vector<8x1xf32> to vector<8x32xf32>
    %402 = arith.cmpf oge, %398, %401 : vector<8x32xf32>
    %cst_135 = arith.constant -3.40282347E+38 : f32
    %403 = vector.broadcast %cst_135 : f32 to vector<8x32xf32>
    %404 = arith.select %402, %403, %398 : vector<8x32xi1>, vector<8x32xf32>
    %cst_136 = arith.constant dense<0xFF800000> : vector<8xf32>
    %405 = vector.multi_reduction <maximumf>, %404, %cst_136 [1] : vector<8x32xf32> to vector<8xf32>
    %406 = vector.shape_cast %405 : vector<8xf32> to vector<8x1xf32>
    %407 = vector.broadcast %406 : vector<8x1xf32> to vector<8x32xf32>
    %408 = arith.cmpf oge, %404, %407 : vector<8x32xf32>
    %cst_137 = arith.constant -3.40282347E+38 : f32
    %409 = vector.broadcast %cst_137 : f32 to vector<8x32xf32>
    %410 = arith.select %408, %409, %404 : vector<8x32xi1>, vector<8x32xf32>
    %cst_138 = arith.constant dense<0xFF800000> : vector<8xf32>
    %411 = vector.multi_reduction <maximumf>, %410, %cst_138 [1] : vector<8x32xf32> to vector<8xf32>
    %412 = vector.shape_cast %411 : vector<8xf32> to vector<8x1xf32>
    %413 = vector.broadcast %412 : vector<8x1xf32> to vector<8x32xf32>
    %414 = arith.cmpf oge, %398, %413 : vector<8x32xf32>
    %cst_139 = arith.constant -1.000000e+06 : f32
    %415 = vector.broadcast %cst_139 : f32 to vector<8x32xf32>
    %416 = arith.select %414, %398, %415 : vector<8x32xi1>, vector<8x32xf32>
    %cst_140 = arith.constant dense<0xFF800000> : vector<8xf32>
    %417 = vector.multi_reduction <maximumf>, %416, %cst_140 [1] : vector<8x32xf32> to vector<8xf32>
    %418 = vector.shape_cast %417 : vector<8xf32> to vector<8x1xf32>
    %419 = vector.broadcast %418 : vector<8x1xf32> to vector<8x32xf32>
    %420 = arith.subf %416, %419 : vector<8x32xf32>
    %421 = math.exp %420 : vector<8x32xf32>
    %cst_141 = arith.constant 0.000000e+00 : f32
    %422 = vector.broadcast %cst_141 : f32 to vector<8x32xf32>
    %423 = arith.select %396, %421, %422 : vector<8x32xi1>, vector<8x32xf32>
    %cst_142 = arith.constant dense<0.000000e+00> : vector<8xf32>
    %424 = vector.multi_reduction <add>, %423, %cst_142 [1] : vector<8x32xf32> to vector<8xf32>
    %425 = vector.shape_cast %424 : vector<8xf32> to vector<8x1xf32>
    %426 = tpu.reciprocal %425 {approx = true} : vector<8x1xf32> -> vector<8x1xf32>
    %427 = vector.broadcast %426 : vector<8x1xf32> to vector<8x32xf32>
    %428 = arith.mulf %423, %427 : vector<8x32xf32>
    %429 = vector.extract_strided_slice %263 {offsets = [0, 3], sizes = [8, 1], strides = [1, 1]} : vector<8x4xf32> to vector<8x1xf32>
    %430 = vector.broadcast %429 : vector<8x1xf32> to vector<8x32xf32>
    %431 = arith.mulf %428, %430 : vector<8x32xf32>
    %432 = arith.addf %391, %431 : vector<8x32xf32>
    %cst_143 = arith.constant dense<0.000000e+00> : vector<8x32xf32>
    %433 = tpu.matmul %432, %229, %cst_143 {dimension_numbers = #tpu.dot_dimension_numbers<[1], [0], [0], [1], [0, 0, 1, 1], [], []>} : vector<8x32xf32>, vector<32x32xf32>, vector<8x32xf32> -> vector<8x32xf32>
    %c8 = arith.constant 8 : index
    %c0_144 = arith.constant 0 : index
    %434 = vector.load %arg13[%c8, %c0_144] : memref<16x32xf32, #tpu.memory_space<vmem>>, vector<8x32xf32>
    tpu.vector_store %arg13[%c8, %c0_144], %433 {strides = array<i32>} : memref<16x32xf32, #tpu.memory_space<vmem>>, vector<8x32xf32>,
    %c0_145 = arith.constant 0 : index
    %c0_146 = arith.constant 0 : index
    %435 = vector.load %arg13[%c0_145, %c0_146] : memref<16x32xf32, #tpu.memory_space<vmem>>, vector<16x32xf32>
    %c0_147 = arith.constant 0 : index
    %c0_148 = arith.constant 0 : index
    %436 = vector.load %arg11[%c0_147, %c0_148] : memref<32x32xf32, #tpu.memory_space<vmem>>, vector<32x32xf32>
    %cst_149 = arith.constant dense<0.000000e+00> : vector<16x32xf32>
    %437 = tpu.matmul %435, %436, %cst_149 {dimension_numbers = #tpu.dot_dimension_numbers<[1], [0], [0], [1], [0, 0, 1, 1], [], []>} : vector<16x32xf32>, vector<32x32xf32>, vector<16x32xf32> -> vector<16x32xf32>
    %c0_150 = arith.constant 0 : index
    %c0_151 = arith.constant 0 : index
    %438 = vector.load %arg12[%c0_150, %c0_151] : memref<16x32xf32, #tpu.memory_space<vmem>>, vector<16x32xf32>
    tpu.vector_store %arg12[%c0_150, %c0_151], %437 {strides = array<i32>} : memref<16x32xf32, #tpu.memory_space<vmem>>, vector<16x32xf32>,
    return
  }
  func.func @transform_0(%arg0: i32, %arg1: memref<2xi32, #tpu.memory_space<smem>>) -> (i32, i32) {
    %c0_i32 = arith.constant 0 : i32
    %c0_i32_0 = arith.constant 0 : i32
    return %arg0, %c0_i32 : i32, i32
  }
  func.func @transform_1(%arg0: i32, %arg1: memref<2xi32, #tpu.memory_space<smem>>) -> (i32, i32) {
    %c0_i32 = arith.constant 0 : i32
    %c0_i32_0 = arith.constant 0 : i32
    return %arg0, %c0_i32 : i32, i32
  }
  func.func @transform_2(%arg0: i32, %arg1: memref<2xi32, #tpu.memory_space<smem>>) -> (i32, i32) {
    %c0_i32 = arith.constant 0 : i32
    %c0_i32_0 = arith.constant 0 : i32
    return %arg0, %c0_i32 : i32, i32
  }
  func.func @transform_3(%arg0: i32, %arg1: memref<2xi32, #tpu.memory_space<smem>>) -> (i32, i32) {
    %c0_i32 = arith.constant 0 : i32
    %c0_i32_0 = arith.constant 0 : i32
    return %arg0, %c0_i32 : i32, i32
  }
  func.func @transform_4(%arg0: i32, %arg1: memref<2xi32, #tpu.memory_space<smem>>) -> (i32, i32) {
    %c0_i32 = arith.constant 0 : i32
    %c0_i32_0 = arith.constant 0 : i32
    %c0_i32_1 = arith.constant 0 : i32
    return %c0_i32, %c0_i32_0 : i32, i32
  }
  func.func @transform_5(%arg0: i32, %arg1: memref<2xi32, #tpu.memory_space<smem>>) -> (i32, i32) {
    %c0_i32 = arith.constant 0 : i32
    %c0_i32_0 = arith.constant 0 : i32
    %c0_i32_1 = arith.constant 0 : i32
    return %c0_i32, %c0_i32_0 : i32, i32
  }
  func.func @transform_6(%arg0: i32, %arg1: memref<2xi32, #tpu.memory_space<smem>>) -> (i32, i32) {
    %c0_i32 = arith.constant 0 : i32
    %c0_i32_0 = arith.constant 0 : i32
    %c0_i32_1 = arith.constant 0 : i32
    return %c0_i32, %c0_i32_0 : i32, i32
  }
  func.func @transform_7(%arg0: i32, %arg1: memref<2xi32, #tpu.memory_space<smem>>) -> (i32, i32) {
    %c0_i32 = arith.constant 0 : i32
    %c0_i32_0 = arith.constant 0 : i32
    %c0_i32_1 = arith.constant 0 : i32
    return %c0_i32, %c0_i32_0 : i32, i32
  }
  func.func @transform_8(%arg0: i32, %arg1: memref<2xi32, #tpu.memory_space<smem>>) -> (i32, i32) {
    %c0_i32 = arith.constant 0 : i32
    %c0_i32_0 = arith.constant 0 : i32
    %c0_i32_1 = arith.constant 0 : i32
    return %c0_i32, %c0_i32_0 : i32, i32
  }
  func.func @transform_9(%arg0: i32, %arg1: memref<2xi32, #tpu.memory_space<smem>>) -> (i32, i32) {
    %c0_i32 = arith.constant 0 : i32
    %c0_i32_0 = arith.constant 0 : i32
    %c0_i32_1 = arith.constant 0 : i32
    return %c0_i32, %c0_i32_0 : i32, i32
  }
  func.func @transform_10(%arg0: i32, %arg1: memref<2xi32, #tpu.memory_space<smem>>) -> (i32, i32) {
    %c0_i32 = arith.constant 0 : i32
    %c0_i32_0 = arith.constant 0 : i32
    return %arg0, %c0_i32 : i32, i32
  }
}

</mosaic_0001>

<bundles_post_ra>
// kernel: tpu_custom_call.1
= control target key start
LH: loop header
LB: loop body
LE: loop exit
PB: predicated region body
PF: predicated region fallthrough
CT: control target
= control target key end

     0   :  { %s2359_s0 = inlined_call_operand.vmem [shape: s32[2], index: 0, kind: input, shape index: {}]   ;;  %s2360_s1 = inlined_call_operand.vmem [shape: f32[16,16], index: 1, kind: input, shape index: {}]   ;;  %s2361_s2 = inlined_call_operand.vmem [shape: f32[8,16], index: 2, kind: input, shape index: {}]   ;;  %s2362_s3 = inlined_call_operand.vmem [shape: f32[64,16], index: 3, kind: input, shape index: {}]   ;;  %s2363_s4 = inlined_call_operand.vmem [shape: f32[64,16], index: 4, kind: input, shape index: {}]   ;;  %s2364_s5 = inlined_call_operand.vmem [shape: f32[16,32], index: 5, kind: input, shape index: {}]   ;;  %s2365_s6 = inlined_call_operand.vmem [shape: f32[16,32], index: 6, kind: input, shape index: {}]   ;;  %s2366_s7 = inlined_call_operand.vmem [shape: f32[16,32], index: 7, kind: input, shape index: {}]   ;;  %s2367_s8 = inlined_call_operand.vmem [shape: f32[16,32], index: 8, kind: input, shape index: {}]   ;;  %s2368_s9 = inlined_call_operand.vmem [shape: f32[16,32], index: 9, kind: input, shape index: {}]   ;;  %s2369_s10 = inlined_call_operand.vmem [shape: f32[32,32], index: 10, kind: input, shape index: {}]   ;;  %s2370_s11 = inlined_call_operand.hbm [shape: f32[16,32], index: 11, kind: output, shape index: {}]  }
   0x1   :  { %s16_s19 = sshll.u32 %s2359_s0, 4  ;;  %s17_s19 = int_to_ptr.vmem [resolvable:$true] %s16_s19 }
   0x2   :  { %s1815_s20 = scalar_lea.vmem %s17_s19, 16  ;;  %p1820_p1 = scmp.lt.s32.totalorder %s17_s19, %s17_s19 }
   0x3   :  { %p1816_p0 = scmp.ne.s32.totalorder %s17_s19, %s1815_s20  ;;  %p1821_p2 = scmp.lt.s32.totalorder %s1815_s20, %s1815_s20 }
   0x5   :  { %p1822_p3 = por %p1821_p2, %p1820_p1 }
   0x7   :  { %p1823_p4 = pnand %p1822_p3, %p1816_p0 }
   0x9   :  { %1826 = shalt.err (!%p1823_p4)  }
   0xa   :  { %s1853_s21 = smov [#allocation4]  }
   0xb   :  { %19 = dma.vmem_to_smem %s17_s19, 16, %s1853_s21, [#allocation3] }
   0xc   :  { %1849 = dma.done.wait [#allocation3], 16 }
   0xd   :  { %1850 = vsyncadd [#allocation3], 4294967280 }
   0xe   :  { %21 = sfence }
   0xf   :  { %v129_v0 = vld [vmem:[%s2365_s6] sm:$0xff]  ;;  %v130_v1 = vld [vmem:[%s2365_s6 + $0x8] sm:$0xff]  ;;  %vm47_vm0 = vcmask 130048  }
  0x10   :  { %v43_v2 = vld [vmem:[%s2360_s1] sm:$0xff]  ;;  %v1704_v3 = vpack.c.bf16 %v130_v1, %v129_v0  ;;  %v291_v5 = vld [vmem:[%s2367_s8 + $0x8] sm:$0xff] }
  0x11   :  { %1593 = vmatprep.mubr.msk.f32.mxu1 %vm47_vm0, %v43_v2  ;;  %v290_v4 = vld [vmem:[%s2367_s8] sm:$0xff]  ;;  %1586 = vmatprep.mubr.msk.f32.mxu0 %vm47_vm0, %v43_v2  ;;  %v46_v8 = vld [vmem:[%s2364_s5 + $0x8] sm:$0xff] }
  0x12   :  { %v1711_v6 = vpack.c.bf16 %v291_v5, %v290_v4  ;;  %v45_v7 = vld [vmem:[%s2364_s5] sm:$0xff]  ;;  %1705 = vmatprep.subr.bf16.mxu1 %v1704_v3  ;;  %v44_v9 = vld [vmem:[%s2360_s1 + $0x8] sm:$0xff] }
  0x13   :  { %1707 = vmatpush3.bf16.msra.mxu1 %v1704_v3  ;;  %v1700_v10 = vpack.c.bf16 %v46_v8, %v45_v7  ;;  %v207_v11 = vld [vmem:[%s2366_s7] sm:$0xff]  ;;  %v208_v12 = vld [vmem:[%s2366_s7 + $0x8] sm:$0xff] }
  0x14   :  { %1712 = vmatprep.subr.bf16.mxu1 %v1711_v6  ;;  %v282_v13 = vld [vmem:[%s2362_s3] sm:$0xff]  ;;  %v430_v15 = vld [vmem:[%s2368_s9 + $0x8] sm:$0xff]  ;;  %v1709_v16 = vpack.c.bf16 %v208_v12, %v207_v11 }
  0x15   :  { %1701 = vmatprep.subr.bf16.mxu0 %v1700_v10  ;;  %v429_v14 = vld [vmem:[%s2368_s9] sm:$0xff] }
  0x16   :  { %1594 = vmatmul.mubr.msk.f32.vlgmr.msra.gmra.mrb[0].mxu1 %vm47_vm0, %v44_v9  ;;  %1703 = vmatpush3.bf16.msra.mxu0 %v1700_v10 }
  0x17   :  { %22 = vsyncpa [#allocation6], 0  ;;  %1714 = vmatpush3.bf16.msra.mxu1 %v1711_v6  ;;  %1607 = vmatprep.mubr.msk.f32.mxu1 %vm47_vm0, %v282_v13  ;;  %v283_v17 = vld [vmem:[%s2362_s3 + $0x8] sm:$0xff]  ;;  %v1854_v18 = vmov 0.0|0.0   ;;  %v284_v19 = vld [vmem:[%s2362_s3 + $0x10] sm:$0xff]  ;;  %v1715_v20 = vpack.c.bf16 %v430_v15, %v429_v14  ;;  %v1855_v21 = vmov 0.0   ;;  %v638_v6 = vlaneseq }
  0x18   :  { %1708 = vmatprep.subr.bf16.mxu0 %v1854_v18  ;;  %1635 = vmatprep.subr.mxu1 %v1855_v21  ;;  %v206_v22 = vld [vmem:[%s2361_s2] sm:$0xff]  ;;  %v285_v23 = vld [vmem:[%s2362_s3 + $0x18] sm:$0xff]  ;;  %vm1856_vm1 = vmmov 0   ;;  %v287_v25 = vld [vmem:[%s2362_s3 + $0x28] sm:$0xff]  ;;  %vm560_vm2 = vcmask 261120   ;;  %s1512_s9 = sld [smem:[#allocation4 + $0x1]] }
  0x19   :  { %1587 = vmatmul.mubr.msk.f32.vlgmr.msra.gmra.mrb[0].mxu0 %vm47_vm0, %v44_v9  ;;  %v286_v24 = vld [vmem:[%s2362_s3 + $0x20] sm:$0xff]  ;;  %v288_v26 = vld [vmem:[%s2362_s3 + $0x30] sm:$0xff]  ;;  %v289_v27 = vld [vmem:[%s2362_s3 + $0x38] sm:$0xff]  ;;  %v2089_v7 = vand.u32 127, %v638_v6  ;;  %vm645_vm15 = vcmask 31744  }
  0x1a   :  { %1608 = vmatmul.mubr.msk.f32.vlgmr.msra.gmra.mrb[2].mxu1 %vm47_vm0, %v283_v17  ;;  %1710 = vmatpush3.bf16.msra.mxu0 %v1709_v16  ;;  %v421_v28 = vld [vmem:[%s2363_s4] sm:$0xff]  ;;  %v422_v29 = vld [vmem:[%s2363_s4 + $0x8] sm:$0xff]  ;;  %v423_v30 = vld [vmem:[%s2363_s4 + $0x10] sm:$0xff] }
  0x1b   :  { %1610 = vmatprep.mubr.msk.f32.mxu1 %vm47_vm0, %v284_v19  ;;  %1600 = vmatprep.mubr.msk.f32.mxu0 %vm1856_vm1, %v1855_v21  ;;  %v424_v31 = vld [vmem:[%s2363_s4 + $0x18] sm:$0xff]  ;;  %v425_v32 = vld [vmem:[%s2363_s4 + $0x20] sm:$0xff]  ;;  %v426_v33 = vld [vmem:[%s2363_s4 + $0x28] sm:$0xff]  ;;  %vm828_vm4 = vcmp.ge.s32.totalorder %v2089_v7, 16  ;;  %vm829_vm5 = vcmp.lt.s32.totalorder %v2089_v7, 24  ;;  %vm865_vm6 = vcmp.ge.s32.totalorder %v2089_v7, 24 }
  0x1c   :  { %1716 = vmatprep.subr.bf16.mxu0 %v1715_v20  ;;  %v427_v34 = vld [vmem:[%s2363_s4 + $0x30] sm:$0xff]  ;;  %v428_v35 = vld [vmem:[%s2363_s4 + $0x38] sm:$0xff]  ;;  %vm2046_vm3 = vmpackc.low %vm560_vm2, %vm560_vm2  ;;  %vm866_vm7 = vcmp.lt.s32.totalorder %v2089_v7, 32  ;;  %vm791_vm8 = vcmp.ge.s32.totalorder %v2089_v7, 8  ;;  %vm792_vm9 = vcmp.lt.s32.totalorder %v2089_v7, 16  ;;  %vm754_vm11 = vcmp.lt.s32.totalorder %v2089_v7, 8 }
  0x1d   :  { %1601 = vmatmul.mubr.msk.f32.vlgmr.msra.gmra.mrb[2].mxu0 %vm47_vm0, %v206_v22  ;;  %vm2097_vm10 = vmand %vm828_vm4, %vm829_vm5  ;;  %s641_s4 = sld [smem:[#allocation4]] }
  0x1e   :  { %1611 = vmatmul.mubr.msk.f32.gmra.mrb[4].mxu1 %vm47_vm0, %v285_v23  ;;  %1718 = vmatpush3.bf16.msra.mxu0 %v1715_v20  ;;  %vm2102_vm12 = vmand %vm865_vm6, %vm866_vm7 }
  0x1f   :  { %1613 = vmatprep.mubr.msk.f32.mxu1 %vm47_vm0, %v286_v24  ;;  %1719 = vmatprep.subr.bf16.mxu0 %v1854_v18  ;;  %vm2106_vm13 = vmand %vm791_vm8, %vm792_vm9 }
  0x20   :  { %1623 = vmatprep.mubr.msk.f32.mxu0 %vm47_vm0, %v421_v28 }
  0x21   :  { %1624 = vmatmul.mubr.msk.f32.vlgmr.msra.gmra.mrb[4].mxu0 %vm47_vm0, %v422_v29 }
  0x22   :  { %1614 = vmatmul.mubr.msk.f32.gmra.mrb[6].mxu1 %vm47_vm0, %v287_v25  ;;  %1626 = vmatprep.mubr.msk.f32.mxu0 %vm47_vm0, %v423_v30 }
  0x23   :  { %1616 = vmatprep.mubr.msk.f32.mxu1 %vm47_vm0, %v288_v26  ;;  %v642_v26 = vstv %s641_s4 }
  0x24   :  { %vm643_vm14 = vcmp.lt.s32.totalorder %v2089_v7, %v642_v26 }
  0x25   :  { %1627 = vmatmul.mubr.msk.f32.gmra.mrb[6].mxu0 %vm47_vm0, %v424_v31  ;;  %v1055_v31 = vstv %s1512_s9 }
  0x26   :  { %1617 = vmatmul.mubr.msk.f32.gmra.mrb[8].mxu1 %vm47_vm0, %v289_v27  ;;  %1629 = vmatprep.mubr.msk.f32.mxu0 %vm47_vm0, %v425_v32 }
  0x27   :  { %1637 = vmatprep.mubr.msk.f32.mxu1 %vm1856_vm1, %v1855_v21 }
  0x29   :  { %1630 = vmatmul.mubr.msk.f32.gmra.mrb[8].mxu0 %vm47_vm0, %v426_v33 }
  0x2a   :  { %1632 = vmatprep.mubr.msk.f32.mxu0 %vm47_vm0, %v427_v34 }
  0x2d   :  { %1633 = vmatmul.mubr.msk.f32.gmra.mrb[10].mxu0 %vm47_vm0, %v428_v35  ;;  %vm1056_vm0 = vcmp.lt.s32.totalorder %v2089_v7, %v1055_v31 }
  0x2e   :  { %1648 = vmatprep.mubr.msk.f32.mxu0 %vm1856_vm1, %v1855_v21 }
  0xe9   :  { %v1595_v36 = vpop.f32.mrb[0].mxu1 }
  0xea   :  { %v197_v37 = vpop.f32.mrb[1].mxu1 }
  0xec   :  { %v1588_v38 = vpop.f32.mrb[0].mxu0 }
  0xed   :  { %v1609_v39 = vpop.f32.mrb[2].mxu1  ;;  %v120_v40 = vpop.f32.mrb[1].mxu0 }
  0xee   :  { %v382_v41 = vpop.f32.mrb[3].mxu1 }
  0xef   :  { %v1720_v43 = vpack.c.bf16 %v1609_v39, %v382_v41 }
  0xf0   :  { %v278_v44 = vpop.f32.mrb[2].mxu0 }
  0xf1   :  { %1722 = vmatpush3.bf16.xpose.msk.msra.mxu0 %vm2046_vm3, %v1720_v43  ;;  %v1612_v45 = vpop.f32.mrb[4].mxu1  ;;  %1636 = vmatpush3.xpose.msk.msra.mxu1 %vm560_vm2, %v278_v44  ;;  %v1602_v46 = vpop.f32.mrb[3].mxu0  ;;  %v976_v55 = vrot.slane %v278_v44, 4 }
  0xf2   :  { %v392_v47 = vpop.f32.mrb[5].mxu1  ;;  %1723 = vmatprep.subr.bf16.mxu0 %v1854_v18  ;;  %1727 = vmatprep.subr.bf16.mxu1 %v1854_v18 }
  0xf3   :  { %v1724_v48 = vpack.c.bf16 %v1612_v45, %v392_v47 }
  0xf4   :  { %1638 = vmatmul.mubr.msk.f32.vlgmr.msra.gmra.mrb[10].mxu1 %vm560_vm2, %v120_v40  ;;  %v1625_v56 = vpop.f32.mrb[4].mxu0 }
  0xf5   :  { %v1615_v49 = vpop.f32.mrb[6].mxu1  ;;  %1659 = vmatprep.mubr.msk.f32.mxu1 %vm1856_vm1, %v1855_v21  ;;  %v521_v57 = vpop.f32.mrb[5].mxu0 }
  0xf6   :  { %v402_v50 = vpop.f32.mrb[7].mxu1  ;;  %v1728_v58 = vpack.c.bf16 %v1625_v56, %v521_v57 }
  0xf7   :  { %v1734_v51 = vpack.c.bf16 %v1615_v49, %v402_v50 }
  0xf8   :  { %v1628_v59 = vpop.f32.mrb[6].mxu0  ;;  %1729 = vmatpush3.bf16.msra.mxu1 %v1728_v58 }
  0xf9   :  { %1726 = vmatpush3.bf16.xpose.msk.msra.mxu0 %vm2046_vm3, %v1724_v48  ;;  %v1618_v52 = vpop.f32.mrb[8].mxu1  ;;  %v531_v60 = vpop.f32.mrb[7].mxu0  ;;  %1730 = vmatprep.subr.bf16.mxu1 %v1854_v18 }
  0xfa   :  { %1662 = vmatprep.subr.mxu0 %v1855_v21  ;;  %v412_v53 = vpop.f32.mrb[9].mxu1  ;;  %v1731_v61 = vpack.c.bf16 %v1628_v59, %v531_v60 }
  0xfb   :  { %v1738_v54 = vpack.c.bf16 %v1618_v52, %v412_v53 }
  0xfc   :  { %v2076_v62 = vpop.f32.mrb[8].mxu0  ;;  %1732 = vmatpush3.bf16.msra.mxu1 %v1731_v61 }
  0xfd   :  { %v2078_v63 = vpop.f32.mrb[9].mxu0  ;;  %1741 = vmatprep.subr.bf16.mxu1 %v1854_v18 }
  0xfe   :  { %v1742_v0 = vpack.c.bf16 %v2076_v62, %v2078_v63 }
 0x100   :  { %1649 = vmatmul.mubr.msk.f32.vlgmr.msra.gmra.mrb[12].mxu0 %vm560_vm2, %v197_v37  ;;  %v2083_v1 = vpop.f32.mrb[10].mxu0 }
 0x101   :  { %1663 = vmatpush3.xpose.msk.msra.mxu0 %vm560_vm2, %v976_v55  ;;  %1664 = vmatprep.mubr.msk.f32.mxu0 %vm1856_vm1, %v1855_v21  ;;  %v2085_v2 = vpop.f32.mrb[11].mxu0 }
 0x102   :  { %1733 = vmatprep.subr.bf16.mxu0 %v1854_v18  ;;  %v1745_v3 = vpack.c.bf16 %v2083_v1, %v2085_v2  ;;  %v1379_v1 = vld [vmem:[%s2369_s10 + $0x8] sm:$0xff] }
 0x104   :  { %1665 = vmatmul.mubr.msk.f32.vlgmr.msra.gmra.mrb[14].mxu0 %vm560_vm2, %v1588_v38 }
 0x105   :  { %1736 = vmatpush3.bf16.xpose.msk.msra.mxu0 %vm2046_vm3, %v1734_v51  ;;  %1675 = vmatprep.mubr.msk.f32.mxu0 %vm1856_vm1, %v1855_v21 }
 0x106   :  { %1737 = vmatprep.subr.bf16.mxu0 %v1854_v18 }
 0x10d   :  { %1740 = vmatpush3.bf16.xpose.msk.msra.mxu0 %vm2046_vm3, %v1738_v54 }
 0x114   :  { %1676 = vmatmul.mubr.msk.f32.vlgmr.msra.gmra.mrb[16].mxu0 %vm560_vm2, %v1595_v36 }
 0x1c7   :  { %v633_v4 = vpop.f32.mrb[10].mxu1 }
 0x1c8   :  { %v1639_v5 = vpop.f32.mrb[11].mxu1  ;;  %v637_v28 = vmul.f32 0.17677669, %v633_v4 }
 0x1ca   :  { %v2147_v36 = vsel %vm643_vm14, %v637_v28, -1000000.0 }
 0x1cb   :  { %v646_v39 = vsel %vm645_vm15, %v2147_v36, -inf }
 0x1d3   :  { %v748_v8 = vpop.f32.mrb[12].mxu0 }
 0x1d4   :  { %v752_v10 = vmul.f32 0.17677669, %v748_v8  ;;  %v1650_v11 = vpop.f32.mrb[13].mxu0 }
 0x1d6   :  { %v2112_v14 = vsel %vm2097_vm10, %v752_v10, -3.4028235e+38  ;;  %v2116_v15 = vsel %vm754_vm11, %v752_v10, -3.4028235e+38  ;;  %v2124_v22 = vsel %vm2102_vm12, %v752_v10, -3.4028235e+38 }
 0x1d7   :  { %v1048_v16 = vpop.f32.mrb[14].mxu0  ;;  %v832_v17 = vsel %vm560_vm2, %v2112_v14, -inf  ;;  %v757_v19 = vsel %vm560_vm2, %v2116_v15, -inf  ;;  %v2128_v23 = vsel %vm2106_vm13, %v752_v10, -3.4028235e+38  ;;  %v869_v24 = vsel %vm560_vm2, %v2124_v22, -inf }
 0x1d8   :  { %833 = vmax.xlane.f32.xlu1 %v832_v17  ;;  %758 = vmax.xlane.f32.xlu0 %v757_v19  ;;  %v1666_v20 = vpop.f32.mrb[15].mxu0  ;;  %v795_v25 = vsel %vm560_vm2, %v2128_v23, -inf  ;;  %v1052_v37 = vmul.f32 0.17677669, %v1048_v16 }
 0x1da   :  { %v2158_v41 = vsel %vm1056_vm0, %v1052_v37, -1000000.0 }
 0x1db   :  { %v1058_v43 = vsel %vm645_vm15, %v2158_v41, -inf }
 0x1dc   :  { %870 = vmax.xlane.f32.xlu1 %v869_v24  ;;  %796 = vmax.xlane.f32.xlu0 %v795_v25 }
 0x1e7   :  { %v1160_v27 = vpop.f32.mrb[16].mxu0 }
 0x1e8   :  { %v1164_v29 = vmul.f32 0.17677669, %v1160_v27  ;;  %v1677_v30 = vpop.f32.mrb[17].mxu0 }
 0x1ea   :  { %v2137_v32 = vsel %vm2106_vm13, %v1164_v29, -3.4028235e+38  ;;  %v2141_v33 = vsel %vm754_vm11, %v1164_v29, -3.4028235e+38  ;;  %v2151_v38 = vsel %vm2097_vm10, %v1164_v29, -3.4028235e+38 }
 0x1eb   :  { %v1201_v34 = vsel %vm560_vm2, %v2137_v32, -inf  ;;  %v1166_v35 = vsel %vm560_vm2, %v2141_v33, -inf  ;;  %v1235_v40 = vsel %vm560_vm2, %v2151_v38, -inf  ;;  %v2162_v42 = vsel %vm2102_vm12, %v1164_v29, -3.4028235e+38 }
 0x1ec   :  { %1202 = vmax.xlane.f32.xlu1 %v1201_v34  ;;  %1167 = vmax.xlane.f32.xlu0 %v1166_v35  ;;  %v1269_v44 = vsel %vm560_vm2, %v2162_v42, -inf }
 0x1f0   :  { %647 = vmax.xlane.f32.xlu1 %v646_v39  ;;  %1236 = vmax.xlane.f32.xlu0 %v1235_v40 }
 0x1f4   :  { %1059 = vmax.xlane.f32.xlu1 %v1058_v43  ;;  %1270 = vmax.xlane.f32.xlu0 %v1269_v44 }
 0x265   :  { %v834_v45 = vpop.xlane.xlu1 %833  ;;  %v759_v46 = vpop.xlane.xlu0 %758 }
 0x266   :  { %vm835_vm3 = vcmp.ge.f32.partialorder %v2112_v14, %v834_v45  ;;  %vm760_vm4 = vcmp.ge.f32.partialorder %v2116_v15, %v759_v46 }
 0x267   :  { %v761_v47 = vsel %vm760_vm4, -3.4028235e+38, %v2116_v15  ;;  %v836_v49 = vsel %vm835_vm3, -3.4028235e+38, %v2112_v14 }
 0x268   :  { %v762_v48 = vsel %vm560_vm2, %v761_v47, -inf  ;;  %v837_v54 = vsel %vm560_vm2, %v836_v49, -inf }
 0x269   :  { %v871_v50 = vpop.xlane.xlu1 %870  ;;  %v797_v51 = vpop.xlane.xlu0 %796  ;;  %763 = vmax.xlane.f32.xlu0 %v762_v48 }
 0x26a   :  { %vm872_vm5 = vcmp.ge.f32.partialorder %v2124_v22, %v871_v50  ;;  %vm798_vm6 = vcmp.ge.f32.partialorder %v2128_v23, %v797_v51 }
 0x26b   :  { %v799_v52 = vsel %vm798_vm6, -3.4028235e+38, %v2128_v23  ;;  %v873_v55 = vsel %vm872_vm5, -3.4028235e+38, %v2124_v22 }
 0x26c   :  { %v800_v53 = vsel %vm560_vm2, %v799_v52, -inf  ;;  %v874_v56 = vsel %vm560_vm2, %v873_v55, -inf }
 0x26d   :  { %801 = vmax.xlane.f32.xlu1 %v800_v53  ;;  %838 = vmax.xlane.f32.xlu0 %v837_v54 }
 0x271   :  { %875 = vmax.xlane.f32.xlu1 %v874_v56 }
 0x279   :  { %v1203_v57 = vpop.xlane.xlu1 %1202  ;;  %v1168_v58 = vpop.xlane.xlu0 %1167 }
 0x27a   :  { %vm1204_vm7 = vcmp.ge.f32.partialorder %v2137_v32, %v1203_v57  ;;  %vm1169_vm8 = vcmp.ge.f32.partialorder %v2141_v33, %v1168_v58 }
 0x27b   :  { %v1205_v59 = vsel %vm1204_vm7, -3.4028235e+38, %v2137_v32  ;;  %v1170_v60 = vsel %vm1169_vm8, -3.4028235e+38, %v2141_v33 }
 0x27c   :  { %v1206_v61 = vsel %vm560_vm2, %v1205_v59, -inf  ;;  %v1171_v4 = vsel %vm560_vm2, %v1170_v60, -inf }
 0x27d   :  { %1207 = vmax.xlane.f32.xlu1 %v1206_v61  ;;  %v648_v5 = vpop.xlane.xlu1 %647  ;;  %1172 = vmax.xlane.f32.xlu0 %v1171_v4  ;;  %v1237_v6 = vpop.xlane.xlu0 %1236 }
 0x27e   :  { %vm649_vm9 = vcmp.ge.f32.partialorder %v2147_v36, %v648_v5  ;;  %vm1238_vm14 = vcmp.ge.f32.partialorder %v2151_v38, %v1237_v6 }
 0x27f   :  { %v1239_v8 = vsel %vm1238_vm14, -3.4028235e+38, %v2151_v38  ;;  %v650_v10 = vsel %vm649_vm9, -3.4028235e+38, %v2147_v36 }
 0x280   :  { %v651_v11 = vsel %vm645_vm15, %v650_v10, -inf  ;;  %v1240_v16 = vsel %vm560_vm2, %v1239_v8, -inf }
 0x281   :  { %652 = vmax.xlane.f32.xlu1 %v651_v11  ;;  %v1060_v17 = vpop.xlane.xlu1 %1059  ;;  %1241 = vmax.xlane.f32.xlu0 %v1240_v16  ;;  %v1271_v19 = vpop.xlane.xlu0 %1270 }
 0x282   :  { %vm1061_vm0 = vcmp.ge.f32.partialorder %v2158_v41, %v1060_v17  ;;  %vm1272_vm3 = vcmp.ge.f32.partialorder %v2162_v42, %v1271_v19 }
 0x283   :  { %v1273_v20 = vsel %vm1272_vm3, -3.4028235e+38, %v2162_v42  ;;  %v1062_v24 = vsel %vm1061_vm0, -3.4028235e+38, %v2158_v41 }
 0x284   :  { %v1063_v25 = vsel %vm645_vm15, %v1062_v24, -inf  ;;  %v1274_v26 = vsel %vm560_vm2, %v1273_v20, -inf }
 0x285   :  { %1064 = vmax.xlane.f32.xlu1 %v1063_v25  ;;  %1275 = vmax.xlane.f32.xlu0 %v1274_v26 }
 0x2f6   :  { %v764_v27 = vpop.xlane.xlu0 %763 }
 0x2f7   :  { %vm765_vm4 = vcmp.ge.f32.partialorder %v761_v47, %v764_v27 }
 0x2f8   :  { %v766_v28 = vsel %vm765_vm4, -3.4028235e+38, %v761_v47 }
 0x2f9   :  { %v767_v29 = vsel %vm560_vm2, %v766_v28, -inf }
 0x2fa   :  { %v802_v30 = vpop.xlane.xlu1 %801  ;;  %768 = vmax.xlane.f32.xlu0 %v767_v29  ;;  %v839_v31 = vpop.xlane.xlu0 %838 }
 0x2fb   :  { %vm803_vm5 = vcmp.ge.f32.partialorder %v799_v52, %v802_v30  ;;  %vm840_vm6 = vcmp.ge.f32.partialorder %v836_v49, %v839_v31 }
 0x2fc   :  { %v804_v34 = vsel %vm803_vm5, -3.4028235e+38, %v799_v52  ;;  %v841_v35 = vsel %vm840_vm6, -3.4028235e+38, %v836_v49 }
 0x2fd   :  { %v805_v37 = vsel %vm560_vm2, %v804_v34, -inf  ;;  %v842_v39 = vsel %vm560_vm2, %v841_v35, -inf }
 0x2fe   :  { %806 = vmax.xlane.f32.xlu1 %v805_v37  ;;  %v876_v40 = vpop.xlane.xlu1 %875  ;;  %843 = vmax.xlane.f32.xlu0 %v842_v39 }
 0x2ff   :  { %vm877_vm7 = vcmp.ge.f32.partialorder %v873_v55, %v876_v40 }
 0x300   :  { %v878_v43 = vsel %vm877_vm7, -3.4028235e+38, %v873_v55 }
 0x301   :  { %v879_v44 = vsel %vm560_vm2, %v878_v43, -inf }
 0x302   :  { %880 = vmax.xlane.f32.xlu1 %v879_v44 }
 0x30a   :  { %v1208_v45 = vpop.xlane.xlu1 %1207  ;;  %v1173_v46 = vpop.xlane.xlu0 %1172 }
 0x30b   :  { %vm1209_vm8 = vcmp.ge.f32.partialorder %v1205_v59, %v1208_v45  ;;  %vm1174_vm9 = vcmp.ge.f32.partialorder %v1170_v60, %v1173_v46  ;;  %v1857_v46 = vmov 1  }
 0x30c   :  { %v1210_v47 = vsel %vm1209_vm8, -3.4028235e+38, %v1205_v59  ;;  %v1175_v48 = vsel %vm1174_vm9, -3.4028235e+38, %v1170_v60  ;;  %1767 = vset.pattern.permute.xlu1 %v1857_v46 }
 0x30d   :  { %v1211_v49 = vsel %vm560_vm2, %v1210_v47, -inf  ;;  %v1176_v50 = vsel %vm560_vm2, %v1175_v48, -inf  ;;  %v1858_v47 = vmov 0  }
 0x30e   :  { %1212 = vmax.xlane.f32.xlu1 %v1211_v49  ;;  %v653_v51 = vpop.xlane.xlu1 %652  ;;  %1177 = vmax.xlane.f32.xlu0 %v1176_v50  ;;  %v1242_v52 = vpop.xlane.xlu0 %1241 }
 0x30f   :  { %vm654_vm14 = vcmp.ge.f32.partialorder %v2147_v36, %v653_v51  ;;  %vm1243_vm0 = vcmp.ge.f32.partialorder %v1239_v8, %v1242_v52  ;;  %1766 = vset.pattern.permute.xlu0 %v1858_v47 }
 0x310   :  { %v655_v53 = vsel %vm654_vm14, %v2147_v36, -1000000.0  ;;  %v1244_v54 = vsel %vm1243_vm0, -3.4028235e+38, %v1239_v8 }
 0x311   :  { %v656_v55 = vsel %vm645_vm15, %v655_v53, -inf  ;;  %v1245_v56 = vsel %vm560_vm2, %v1244_v54, -inf }
 0x312   :  { %657 = vmax.xlane.f32.xlu1 %v656_v55  ;;  %v1065_v57 = vpop.xlane.xlu1 %1064  ;;  %1246 = vmax.xlane.f32.xlu0 %v1245_v56  ;;  %v1276_v58 = vpop.xlane.xlu0 %1275 }
 0x313   :  { %vm1066_vm3 = vcmp.ge.f32.partialorder %v2158_v41, %v1065_v57  ;;  %vm1277_vm4 = vcmp.ge.f32.partialorder %v1273_v20, %v1276_v58 }
 0x314   :  { %v1067_v59 = vsel %vm1066_vm3, %v2158_v41, -1000000.0  ;;  %v1278_v60 = vsel %vm1277_vm4, -3.4028235e+38, %v1273_v20 }
 0x315   :  { %v1068_v61 = vsel %vm645_vm15, %v1067_v59, -inf  ;;  %v1279_v4 = vsel %vm560_vm2, %v1278_v60, -inf }
 0x316   :  { %1069 = vmax.xlane.f32.xlu1 %v1068_v61  ;;  %1280 = vmax.xlane.f32.xlu0 %v1279_v4 }
 0x387   :  { %v769_v36 = vpop.xlane.xlu0 %768 }
 0x388   :  { %vm770_vm5 = vcmp.ge.f32.partialorder %v2116_v15, %v769_v36 }
 0x389   :  { %v771_v5 = vsel %vm770_vm5, %v2116_v15, -1000000.0 }
 0x38a   :  { %v772_v6 = vsel %vm560_vm2, %v771_v5, -inf }
 0x38b   :  { %v807_v8 = vpop.xlane.xlu1 %806  ;;  %773 = vmax.xlane.f32.xlu0 %v772_v6  ;;  %v844_v10 = vpop.xlane.xlu0 %843 }
 0x38c   :  { %vm808_vm6 = vcmp.ge.f32.partialorder %v2128_v23, %v807_v8  ;;  %vm845_vm7 = vcmp.ge.f32.partialorder %v2112_v14, %v844_v10 }
 0x38d   :  { %v809_v41 = vsel %vm808_vm6, %v2128_v23, -1000000.0  ;;  %v846_v11 = vsel %vm845_vm7, %v2112_v14, -1000000.0 }
 0x38e   :  { %v810_v16 = vsel %vm560_vm2, %v809_v41, -inf  ;;  %v847_v17 = vsel %vm560_vm2, %v846_v11, -inf }
 0x38f   :  { %811 = vmax.xlane.f32.xlu1 %v810_v16  ;;  %v881_v19 = vpop.xlane.xlu1 %880  ;;  %848 = vmax.xlane.f32.xlu0 %v847_v17 }
 0x390   :  { %vm882_vm8 = vcmp.ge.f32.partialorder %v2124_v22, %v881_v19 }
 0x391   :  { %v883_v15 = vsel %vm882_vm8, %v2124_v22, -1000000.0 }
 0x392   :  { %v884_v20 = vsel %vm560_vm2, %v883_v15, -inf }
 0x393   :  { %885 = vmax.xlane.f32.xlu1 %v884_v20 }
 0x39b   :  { %v1213_v24 = vpop.xlane.xlu1 %1212  ;;  %v1178_v25 = vpop.xlane.xlu0 %1177 }
 0x39c   :  { %vm1214_vm9 = vcmp.ge.f32.partialorder %v2137_v32, %v1213_v24  ;;  %vm1179_vm14 = vcmp.ge.f32.partialorder %v2141_v33, %v1178_v25 }
 0x39d   :  { %v2227_v14 = vsel %vm1214_vm9, %v2137_v32, -1000000.0  ;;  %v2230_v23 = vsel %vm1179_vm14, %v2141_v33, -1000000.0 }
 0x39e   :  { %v1216_v26 = vsel %vm560_vm2, %v2227_v14, -inf  ;;  %v1181_v22 = vsel %vm560_vm2, %v2230_v23, -inf }
 0x39f   :  { %1217 = vmax.xlane.f32.xlu1 %v1216_v26  ;;  %v658_v27 = vpop.xlane.xlu1 %657  ;;  %1182 = vmax.xlane.f32.xlu0 %v1181_v22  ;;  %v1247_v28 = vpop.xlane.xlu0 %1246 }
 0x3a0   :  { %v659_v29 = vsub.f32 %v655_v53, %v658_v27  ;;  %vm1248_vm0 = vcmp.ge.f32.partialorder %v2151_v38, %v1247_v28 }
 0x3a1   :  { %v2238_v30 = vsel %vm1248_vm0, %v2151_v38, -1000000.0 }
 0x3a2   :  { %v660_v32 = vmul.f32 1.442695, %v659_v29  ;;  %v1250_v33 = vsel %vm560_vm2, %v2238_v30, -inf }
 0x3a3   :  { %v1070_v31 = vpop.xlane.xlu1 %1069  ;;  %1251 = vmax.xlane.f32.xlu0 %v1250_v33  ;;  %v1281_v39 = vpop.xlane.xlu0 %1280 }
 0x3a4   :  { %1775 = vpow2.f32 %v660_v32  ;;  %v1071_v34 = vsub.f32 %v1067_v59, %v1070_v31  ;;  %vm1282_vm3 = vcmp.ge.f32.partialorder %v2162_v42, %v1281_v39 }
 0x3a5   :  { %v2252_v44 = vsel %vm1282_vm3, %v2162_v42, -1000000.0 }
 0x3a6   :  { %v1072_v35 = vmul.f32 1.442695, %v1071_v34  ;;  %v1284_v45 = vsel %vm560_vm2, %v2252_v44, -inf }
 0x3a8   :  { %1777 = vpow2.f32 %v1072_v35 }
 0x3ae   :  { %v2242_v37 = vpop.eup %1775 }
 0x3af   :  { %v662_v40 = vsel %vm645_vm15, %v2242_v37, 0.0 }
 0x3b0   :  { %663 = vadd.xlane.f32.xlu0 %v662_v40  ;;  %v1859_v40 = vmov 2  }
 0x3b2   :  { %v2247_v38 = vpop.eup %1777 }
 0x3b3   :  { %v1074_v43 = vsel %vm645_vm15, %v2247_v38, 0.0 }
 0x3b4   :  { %1075 = vadd.xlane.f32.xlu1 %v1074_v43  ;;  %v1860_v43 = vmov 3  }
 0x3b8   :  { %1285 = vmax.xlane.f32.xlu1 %v1284_v45 }
 0x418   :  { %v774_v48 = vpop.xlane.xlu0 %773 }
 0x419   :  { %v775_v49 = vsub.f32 %v771_v5, %v774_v48 }
 0x41b   :  { %v776_v50 = vmul.f32 1.442695, %v775_v49 }
 0x41c   :  { %v812_v51 = vpop.xlane.xlu1 %811  ;;  %v849_v52 = vpop.xlane.xlu0 %848 }
 0x41d   :  { %1779 = vpow2.f32 %v776_v50  ;;  %v813_v53 = vsub.f32 %v809_v41, %v812_v51  ;;  %v850_v54 = vsub.f32 %v846_v11, %v849_v52 }
 0x41f   :  { %v814_v42 = vmul.f32 1.442695, %v813_v53  ;;  %v851_v55 = vmul.f32 1.442695, %v850_v54 }
 0x420   :  { %v886_v56 = vpop.xlane.xlu1 %885 }
 0x421   :  { %1781 = vpow2.f32 %v814_v42  ;;  %v887_v57 = vsub.f32 %v883_v15, %v886_v56 }
 0x422   :  { %1783 = vpow2.f32 %v851_v55 }
 0x423   :  { %v888_v58 = vmul.f32 1.442695, %v887_v57 }
 0x425   :  { %1785 = vpow2.f32 %v888_v58 }
 0x427   :  { %v1780_v59 = vpop.eup %1779 }
 0x428   :  { %v2260_v60 = vsel %vm754_vm11, %v1780_v59, 0.0 }
 0x429   :  { %v779_v61 = vsel %vm560_vm2, %v2260_v60, 0.0 }
 0x42a   :  { %780 = vadd.xlane.f32.xlu0 %v779_v61 }
 0x42b   :  { %v1782_v4 = vpop.eup %1781 }
 0x42c   :  { %v1784_v36 = vpop.eup %1783  ;;  %v1218_v5 = vpop.xlane.xlu1 %1217  ;;  %v2266_v8 = vsel %vm2106_vm13, %v1782_v4, 0.0 }
 0x42d   :  { %v1183_v6 = vpop.xlane.xlu0 %1182  ;;  %v1219_v10 = vsub.f32 %v2227_v14, %v1218_v5  ;;  %v817_v11 = vsel %vm560_vm2, %v2266_v8, 0.0  ;;  %v2274_v16 = vsel %vm2097_vm10, %v1784_v36, 0.0 }
 0x42e   :  { %v1184_v41 = vsub.f32 %v2230_v23, %v1183_v6  ;;  %818 = vadd.xlane.f32.xlu1 %v817_v11  ;;  %v854_v17 = vsel %vm560_vm2, %v2274_v16, 0.0 }
 0x42f   :  { %v1786_v19 = vpop.eup %1785  ;;  %v1220_v15 = vmul.f32 1.442695, %v1219_v10  ;;  %855 = vadd.xlane.f32.xlu0 %v854_v17 }
 0x430   :  { %v1185_v20 = vmul.f32 1.442695, %v1184_v41  ;;  %v2280_v25 = vsel %vm2102_vm12, %v1786_v19, 0.0 }
 0x431   :  { %v1252_v24 = vpop.xlane.xlu0 %1251  ;;  %1787 = vpow2.f32 %v1220_v15  ;;  %v891_v23 = vsel %vm560_vm2, %v2280_v25, 0.0 }
 0x432   :  { %v1253_v14 = vsub.f32 %v2238_v30, %v1252_v24  ;;  %1789 = vpow2.f32 %v1185_v20  ;;  %892 = vadd.xlane.f32.xlu1 %v891_v23 }
 0x434   :  { %v1254_v26 = vmul.f32 1.442695, %v1253_v14 }
 0x436   :  { %1791 = vpow2.f32 %v1254_v26 }
 0x43b   :  { %v1788_v22 = vpop.eup %1787 }
 0x43c   :  { %v1790_v27 = vpop.eup %1789  ;;  %v2287_v28 = vsel %vm2106_vm13, %v1788_v22, 0.0 }
 0x43d   :  { %v664_v29 = vpop.xlane.xlu0 %663  ;;  %v1223_v32 = vsel %vm560_vm2, %v2287_v28, 0.0  ;;  %v2293_v30 = vsel %vm754_vm11, %v1790_v27, 0.0 }
 0x43e   :  { %1224 = vadd.xlane.f32.xlu1 %v1223_v32  ;;  %v1188_v33 = vsel %vm560_vm2, %v2293_v30, 0.0  ;;  %1793 = vrcp.f32 %v664_v29 }
 0x43f   :  { %1189 = vadd.xlane.f32.xlu0 %v1188_v33 }
 0x440   :  { %v1792_v31 = vpop.eup %1791 }
 0x441   :  { %v2299_v13 = vsel %vm2097_vm10, %v1792_v31, 0.0  ;;  %v1076_v39 = vpop.xlane.xlu1 %1075 }
 0x442   :  { %v1257_v34 = vsel %vm560_vm2, %v2299_v13, 0.0  ;;  %1795 = vrcp.f32 %v1076_v39 }
 0x443   :  { %1258 = vadd.xlane.f32.xlu0 %v1257_v34 }
 0x448   :  { %v1794_v35 = vpop.eup %1793 }
 0x449   :  { %v666_v7 = vmul.f32 %v1794_v35, %v2242_v37  ;;  %v1286_v37 = vpop.xlane.xlu1 %1285 }
 0x44a   :  { %v1287_v48 = vsub.f32 %v2252_v44, %v1286_v37 }
 0x44c   :  { %v1796_v45 = vpop.eup %1795  ;;  %v1288_v49 = vmul.f32 1.442695, %v1287_v48 }
 0x44d   :  { %v1078_v9 = vmul.f32 %v1796_v45, %v2247_v38 }
 0x44e   :  { %1797 = vpow2.f32 %v1288_v49 }
 0x44f   :  { %823 = vperm.xlu1 %1767, %v666_v7  }
 0x453   :  { %1768 = vset.pattern.permute.xlu1 %v1859_v40 }
 0x454   :  { %860 = vperm.xlu1 %1768, %v666_v7  }
 0x458   :  { %1769 = vset.pattern.permute.xlu1 %v1860_v43  ;;  %v1798_v50 = vpop.eup %1797 }
 0x459   :  { %786 = vperm.xlu0 %1766, %v666_v7   ;;  %897 = vperm.xlu1 %1769, %v666_v7   ;;  %v1290_v51 = vsel %vm2102_vm12, %v1798_v50, 0.0 }
 0x45a   :  { %v1291_v38 = vsel %vm560_vm2, %v1290_v51, 0.0 }
 0x45d   :  { %1770 = vset.pattern.permute.xlu1 %v1858_v47  ;;  %1774 = vset.pattern.permute.xlu0 %v1860_v43 }
 0x45e   :  { %1195 = vperm.xlu1 %1770, %v1078_v9  }
 0x462   :  { %1771 = vset.pattern.permute.xlu1 %v1857_v46 }
 0x463   :  { %1229 = vperm.xlu1 %1771, %v1078_v9  }
 0x467   :  { %1772 = vset.pattern.permute.xlu1 %v1859_v40 }
 0x468   :  { %1263 = vperm.xlu1 %1772, %v1078_v9  }
 0x46c   :  { %1773 = vset.pattern.permute.xlu1 %v1860_v43 }
 0x48c   :  { %1292 = vadd.xlane.f32.xlu1 %v1291_v38 }
 0x49d   :  { %1297 = vperm.xlu1 %1773, %v1078_v9  }
 0x4b7   :  { %v781_v52 = vpop.xlane.xlu0 %780 }
 0x4b8   :  { %1799 = vrcp.f32 %v781_v52 }
 0x4bb   :  { %v819_v47 = vpop.xlane.xlu1 %818 }
 0x4bc   :  { %v856_v53 = vpop.xlane.xlu0 %855  ;;  %1801 = vrcp.f32 %v819_v47 }
 0x4bd   :  { %1803 = vrcp.f32 %v856_v53 }
 0x4bf   :  { %v893_v46 = vpop.xlane.xlu1 %892 }
 0x4c0   :  { %1805 = vrcp.f32 %v893_v46 }
 0x4c2   :  { %v1800_v55 = vpop.eup %1799 }
 0x4c3   :  { %v783_v61 = vmul.f32 %v1800_v55, %v2260_v60 }
 0x4c6   :  { %v1802_v12 = vpop.eup %1801 }
 0x4c7   :  { %v1804_v58 = vpop.eup %1803  ;;  %v821_v59 = vmul.f32 %v1802_v12, %v2266_v8 }
 0x4c8   :  { %v858_v10 = vmul.f32 %v1804_v58, %v2274_v16 }
 0x4ca   :  { %v1806_v4 = vpop.eup %1805 }
 0x4cb   :  { %v1225_v54 = vpop.xlane.xlu1 %1224  ;;  %v895_v19 = vmul.f32 %v1806_v4, %v2280_v25 }
 0x4cc   :  { %v1190_v44 = vpop.xlane.xlu0 %1189  ;;  %1807 = vrcp.f32 %v1225_v54 }
 0x4cd   :  { %1809 = vrcp.f32 %v1190_v44 }
 0x4cf   :  { %v824_v42 = vpop.permute.xlu1 %823 }
 0x4d0   :  { %v1259_v57 = vpop.xlane.xlu0 %1258  ;;  %v826_v6 = vmul.f32 %v824_v42, %v821_v59 }
 0x4d1   :  { %1811 = vrcp.f32 %v1259_v57 }
 0x4d3   :  { %v861_v56 = vpop.permute.xlu1 %860 }
 0x4d4   :  { %v863_v11 = vmul.f32 %v861_v56, %v858_v10 }
 0x4d6   :  { %v1808_v15 = vpop.eup %1807 }
 0x4d7   :  { %v1810_v23 = vpop.eup %1809  ;;  %v1227_v26 = vmul.f32 %v1808_v15, %v2287_v28 }
 0x4d8   :  { %v787_v36 = vpop.permute.xlu0 %786  ;;  %v898_v5 = vpop.permute.xlu1 %897  ;;  %v1192_v60 = vmul.f32 %v1810_v23, %v2293_v30 }
 0x4d9   :  { %v789_v41 = vmul.f32 %v787_v36, %v783_v61  ;;  %v900_v24 = vmul.f32 %v898_v5, %v895_v19 }
 0x4db   :  { %v827_v17 = vadd.f32 %v826_v6, %v789_v41  ;;  %v1812_v25 = vpop.eup %1811 }
 0x4dc   :  { %v1261_v28 = vmul.f32 %v1812_v25, %v2299_v13  ;;  %v1381_v13 = vld [vmem:[%s2369_s10 + $0x18] sm:$0xff] }
 0x4dd   :  { %v864_v20 = vadd.f32 %v863_v11, %v827_v17  ;;  %v1196_v14 = vpop.permute.xlu1 %1195 }
 0x4de   :  { %v1198_v22 = vmul.f32 %v1196_v14, %v1192_v60 }
 0x4df   :  { %v901_v8 = vadd.f32 %v900_v24, %v864_v20 }
 0x4e1   :  { %1660 = vmatmul.mubr.msk.f32.vlgmr.msra.gmra.mrb[12].mxu1 %vm560_vm2, %v901_v8 }
 0x4e2   :  { %1743 = vmatpush3.bf16.msra.mxu1 %v1742_v0  ;;  %v1230_v16 = vpop.permute.xlu1 %1229  ;;  %1686 = vmatprep.mubr.msk.f32.mxu1 %vm1856_vm1, %v1855_v21 }
 0x4e3   :  { %v1232_v27 = vmul.f32 %v1230_v16, %v1227_v26  ;;  %1744 = vmatprep.subr.bf16.mxu1 %v1854_v18  ;;  %v1378_v18 = vld [vmem:[%s2369_s10] sm:$0xff] }
 0x4e4   :  { %v1747_v2 = vpack.c.bf16 %v1379_v1, %v1378_v18 }
 0x4e5   :  { %v1233_v29 = vadd.f32 %v1232_v27, %v1198_v22 }
 0x4e6   :  { %1746 = vmatpush3.bf16.msra.mxu1 %v1745_v3  ;;  %v1380_v3 = vld [vmem:[%s2369_s10 + $0x10] sm:$0xff]  ;;  %s1861_s10 = smov [#allocation5]  }
 0x4e7   :  { %v1264_v32 = vpop.permute.xlu1 %1263  ;;  %v1751_v35 = vpack.c.bf16 %v1381_v13, %v1380_v3  ;;  %1748 = vmatprep.subr.bf16.mxu1 %v1747_v2  ;;  %s1470_s13 = sshll.u32 %s1861_s10, 4  ;;  %s1471_s13 = int_to_ptr.vmem [resolvable:$true] %s1470_s13 }
 0x4e8   :  { %v1266_v30 = vmul.f32 %v1264_v32, %v1261_v28  ;;  %s1827_s14 = scalar_lea.vmem %s1471_s13, 256  ;;  %p1832_p6 = scmp.lt.s32.totalorder %s1471_s13, %s1471_s13 }
 0x4e9   :  { %p1828_p5 = scmp.ne.s32.totalorder %s1471_s13, %s1827_s14  ;;  %p1833_p7 = scmp.lt.s32.totalorder %s1827_s14, %s1827_s14 }
 0x4ea   :  { %v1267_v62 = vadd.f32 %v1266_v30, %v1233_v29 }
 0x4eb   :  { %p1834_p8 = por %p1833_p7, %p1832_p6 }
 0x4ed   :  { %p1835_p9 = pnand %p1834_p8, %p1828_p5 }
 0x519   :  { %v1293_v63 = vpop.xlane.xlu1 %1292 }
 0x51a   :  { %1813 = vrcp.f32 %v1293_v63 }
 0x51d   :  { %v1298_v21 = vpop.permute.xlu1 %1297 }
 0x524   :  { %v1814_v0 = vpop.eup %1813 }
 0x525   :  { %v1295_v33 = vmul.f32 %v1814_v0, %v1290_v51 }
 0x527   :  { %v1300_v31 = vmul.f32 %v1298_v21, %v1295_v33 }
 0x529   :  { %v1301_v34 = vadd.f32 %v1300_v31, %v1267_v62 }
 0x52b   :  { %1687 = vmatmul.mubr.msk.f32.vlgmr.msra.gmra.mrb[14].mxu1 %vm560_vm2, %v1301_v34 }
 0x52c   :  { %1750 = vmatpush3.bf16.msra.mxu1 %v1747_v2 }
 0x52d   :  { %1752 = vmatprep.subr.bf16.mxu1 %v1751_v35 }
 0x530   :  { %1754 = vmatpush3.bf16.msra.mxu1 %v1751_v35 }
 0x5b4   :  { %v971_v39 = vpop.f32.mrb[12].mxu1 }
 0x5b5   :  { %975 = vst.msk [vmem:[#allocation2] sm:$0xff] %vm560_vm2, %v971_v39  ;;  %v1661_v7 = vpop.f32.mrb[13].mxu1 }
 0x5bc   :  { %v1376_v40 = vld [vmem:[#allocation2] sm:$0xff] }
 0x5bd   :  { %1697 = vmatprep.mubr.msk.f32.mxu1 %vm560_vm2, %v1376_v40 }
 0x5fe   :  { %v1371_v43 = vpop.f32.mrb[14].mxu1 }
 0x5ff   :  { %1375 = vst.msk [vmem:[#allocation2 + $0x8] sm:$0xff] %vm560_vm2, %v1371_v43  ;;  %v1688_v45 = vpop.f32.mrb[15].mxu1 }
 0x606   :  { %v1377_v9 = vld [vmem:[#allocation2 + $0x8] sm:$0xff] }
 0x607   :  { %1698 = vmatmul.mubr.msk.f32.vlgmr.msra.gmra.mrb[16].mxu1 %vm560_vm2, %v1377_v9 }
 0x6da   :  { %v1699_v37 = vpop.f32.mrb[16].mxu1 }
 0x6db   :  { %1464 = vst.msk [vmem:[#allocation5 + $0x8] sm:$0xff] %vm560_vm2, %v1699_v37  ;;  %v1454_v48 = vpop.f32.mrb[17].mxu1 }
 0x6dc   :  { %1463 = vst.msk [vmem:[#allocation5] sm:$0xff] %vm560_vm2, %v1454_v48 }
 0x6dd   :  { %1838 = shalt.err (!%p1835_p9)
}
 0x6de   :  { %s1839_s17 = scalar_lea.hbm %s2370_s11, 256 }
 0x6df   :  { %p1840_p10 = scmp.ne.s32.totalorder %s2370_s11, %s1839_s17  ;;  %p1843_p11 = scmp.lt.u32.totalorder %s1839_s17, %s2370_s11 }
 0x6e1   :  { %p1845_p12 = pnand %p1843_p11, %p1840_p10 }
 0x6e3   :  { %1848 = shalt.err (!%p1845_p12)
}
 0x6e4   :  { %s1862_s3 = smov 128   ;;  %s1863_s21 = smov 8  }
 0x6e5   :  { %1476 = dma.vmem_to_hbm [thread:$0]  %s1471_s13, 256, %s2370_s11, [#allocation6], %s1862_s3, %s1862_s3, %s1863_s21  }
 0x6e6   :  { %1851 = dma.done.wait [#allocation6], 256  }
 0x6e7   :  { %1852 = vsyncadd [#allocation6], 4294967040 }
 0x6e8   :  { %1480 = vsyncpa [#allocation6], 1 }

</bundles_post_ra>
